<compile_context>
chip_gen: v6e
topology: v6e:2x2x1
jax: 0.10.0
libtpu: 0.0.40
codegen_flags: <defaults>
</compile_context>

<pallas_src>
import numpy as np

import jax
import jax.numpy as jnp
from jax.experimental import pallas as pl
from jax.experimental.pallas import tpu as pltpu


# ------------------------------ fused kernel --------------------------------

def _mynet_kernel(x_ref, c1w_ref, c1b_ref, t1_ref, s1_ref,
                  c2w_ref, c2b_ref, t2_ref, s2_ref,
                  fc1v_ref, fc1b_ref, fc2w_ref, fc2b_ref,
                  ow_ref, ob_ref, o_ref):
    f32 = jnp.float32
    x = x_ref[0, 0]                                            # (28, 28)

    # conv1 + bias + ReLU.  Output layout: rows = h (24), lanes = w*6 + cout.
    c1 = jnp.dot(x[0:24, :], c1w_ref[0], preferred_element_type=f32)
    for i in range(1, 5):
        c1 = c1 + jnp.dot(x[i:i + 24, :], c1w_ref[i],
                          preferred_element_type=f32)
    c1 = jnp.maximum(c1 + c1b_ref[...], 0.0)                   # (24, 144)

    # 2x2 max-pool via exact 0/1 selection matmuls (rows, then lanes).
    r1 = jnp.maximum(jnp.dot(t1_ref[0], c1, preferred_element_type=f32),
                     jnp.dot(t1_ref[1], c1, preferred_element_type=f32))
    p1 = jnp.maximum(jnp.dot(r1, s1_ref[0], preferred_element_type=f32),
                     jnp.dot(r1, s1_ref[1], preferred_element_type=f32))
    # p1: rows = h (12), lanes = w*6 + cin                      (12, 72)

    # conv2 + bias + ReLU.  Output layout: rows = h (8), lanes = w*12 + cout.
    c2 = jnp.dot(p1[0:8, :], c2w_ref[0], preferred_element_type=f32)
    for i in range(1, 5):
        c2 = c2 + jnp.dot(p1[i:i + 8, :], c2w_ref[i],
                          preferred_element_type=f32)
    c2 = jnp.maximum(c2 + c2b_ref[...], 0.0)                   # (8, 96)

    # 2x2 max-pool.
    r2 = jnp.maximum(jnp.dot(t2_ref[0], c2, preferred_element_type=f32),
                     jnp.dot(t2_ref[1], c2, preferred_element_type=f32))
    p2 = jnp.maximum(jnp.dot(r2, s2_ref[0], preferred_element_type=f32),
                     jnp.dot(r2, s2_ref[1], preferred_element_type=f32))
    # p2: rows = h (4), lanes = w*12 + cout                     (4, 48)

    # fc1 + ReLU (torch's NCHW flatten is folded into fc1v's permutation).
    y = fc1b_ref[...]                                          # (1, 120)
    for h in range(4):
        y = y + jnp.dot(p2[h:h + 1, :], fc1v_ref[h],
                        preferred_element_type=f32)
    y = jnp.maximum(y, 0.0)

    # fc2 + ReLU.
    y = jnp.maximum(jnp.dot(y, fc2w_ref[...], preferred_element_type=f32)
                    + fc2b_ref[...], 0.0)                      # (1, 60)

    # output layer (logits).
    o_ref[0] = jnp.dot(y, ow_ref[...],
                       preferred_element_type=f32) + ob_ref[...]   # (1, 10)


# ---------------------- init-time weight preparation -------------------------

_WKEYS = ("c1w", "c1b", "t1", "s1", "c2w", "c2b", "t2", "s2",
          "fc1v", "fc1b", "fc2w", "fc2b", "ow", "ob")


def prepare_weights(params):
    """Rearrange torch-layout weights into kernel tensors (done once)."""
    w1 = np.asarray(params["conv1_w"], np.float32)   # (6, 1, 5, 5)
    b1 = np.asarray(params["conv1_b"], np.float32)   # (6,)
    w2 = np.asarray(params["conv2_w"], np.float32)   # (12, 6, 5, 5)
    b2 = np.asarray(params["conv2_b"], np.float32)   # (12,)
    fc1_w = np.asarray(params["fc1_w"], np.float32)  # (120, 192)
    fc1_b = np.asarray(params["fc1_b"], np.float32)
    fc2_w = np.asarray(params["fc2_w"], np.float32)  # (60, 120)
    fc2_b = np.asarray(params["fc2_b"], np.float32)
    ow = np.asarray(params["out_w"], np.float32)     # (10, 60)
    ob = np.asarray(params["out_b"], np.float32)

    def conv_band(w, wout):
        # B[i, (wpos+j)*Cin + ci, wpos*Cout + co] = w[co, ci, i, j]
        cout, cin, kh, kw = w.shape
        win = wout + kw - 1
        B = np.zeros((kh, win * cin, wout * cout), np.float32)
        for i in range(kh):
            for wpos in range(wout):
                for j in range(kw):
                    for ci in range(cin):
                        for co in range(cout):
                            B[i, (wpos + j) * cin + ci, wpos * cout + co] = \
                                w[co, ci, i, j]
        return B

    def row_sel(hout):
        T = np.zeros((2, hout, 2 * hout), np.float32)
        for d in range(2):
            for h in range(hout):
                T[d, h, 2 * h + d] = 1.0
        return T

    def lane_sel(wout, c):
        S = np.zeros((2, 2 * wout * c, wout * c), np.float32)
        for d in range(2):
            for w in range(wout):
                for cc in range(c):
                    S[d, (2 * w + d) * c + cc, w * c + cc] = 1.0
        return S

    # fc1 weights permuted so the in-kernel (4, 48) pooled layout contracts
    # exactly like torch's flatten(1,-1) on a (12, 4, 4) CHW tensor.
    V = np.zeros((4, 48, 120), np.float32)
    for h in range(4):
        for b in range(4):
            for co in range(12):
                V[h, b * 12 + co, :] = fc1_w[:, co * 16 + h * 4 + b]

    tensors = {
        "c1w": conv_band(w1, 24),             # (5, 28, 144)
        "c1b": np.tile(b1, 24)[None, :],      # (1, 144)
        "t1": row_sel(12),                    # (2, 12, 24)
        "s1": lane_sel(12, 6),                # (2, 144, 72)
        "c2w": conv_band(w2, 8),              # (5, 72, 96)
        "c2b": np.tile(b2, 8)[None, :],       # (1, 96)
        "t2": row_sel(4),                     # (2, 4, 8)
        "s2": lane_sel(4, 12),                # (2, 96, 48)
        "fc1v": V,                            # (4, 48, 120)
        "fc1b": fc1_b[None, :],               # (1, 120)
        "fc2w": np.ascontiguousarray(fc2_w.T),  # (120, 60)
        "fc2b": fc2_b[None, :],               # (1, 60)
        "ow": np.ascontiguousarray(ow.T),     # (60, 10)
        "ob": ob[None, :],                    # (1, 10)
    }
    return {k: jnp.asarray(v) for k, v in tensors.items()}


# -------------------------------- forward -----------------------------------

def _const_map(ndim):
    idx = (0,) * ndim
    return lambda b: idx


@jax.jit
def mynet_forward(tensors, x_nchw):
    """x_nchw: (B, 1, 28, 28) float32 -> (B, 10) logits."""
    B = x_nchw.shape[0]
    w_list = [tensors[k] for k in _WKEYS]

    in_specs = [pl.BlockSpec((1, 1, 28, 28), lambda b: (b, 0, 0, 0))]
    in_specs += [pl.BlockSpec(t.shape, _const_map(t.ndim)) for t in w_list]

    out = pl.pallas_call(
        _mynet_kernel,
        out_shape=jax.ShapeDtypeStruct((B, 1, 10), jnp.float32),
        grid_spec=pltpu.PrefetchScalarGridSpec(
            num_scalar_prefetch=0,
            grid=(B,),
            in_specs=in_specs,
            out_specs=pl.BlockSpec((1, 1, 10), lambda b: (b, 0, 0)),
        ),
        compiler_params=pltpu.CompilerParams(
            dimension_semantics=("parallel",)),
    )(x_nchw.astype(jnp.float32), *w_list)
    return out[:, 0, :]


# --------------------------- parameter init ----------------------------------

def init_params(key):
    ks = jax.random.split(key, 10)

    def u(k, shape, fan_in):
        bound = 1.0 / jnp.sqrt(fan_in)
        return jax.random.uniform(k, shape, jnp.float32, -bound, bound)

    return {
        "conv1_w": u(ks[0], (6, 1, 5, 5), 1 * 5 * 5),
        "conv1_b": u(ks[1], (6,), 1 * 5 * 5),
        "conv2_w": u(ks[2], (12, 6, 5, 5), 6 * 5 * 5),
        "conv2_b": u(ks[3], (12,), 6 * 5 * 5),
        "fc1_w": u(ks[4], (120, 192), 192),
        "fc1_b": u(ks[5], (120,), 192),
        "fc2_w": u(ks[6], (60, 120), 120),
        "fc2_b": u(ks[7], (60,), 120),
        "out_w": u(ks[8], (10, 60), 60),
        "out_b": u(ks[9], (10,), 60),
    }


# --------------------------- pure-JAX reference ------------------------------

def ref_forward(params, x):
    dn = ("NCHW", "OIHW", "NCHW")
    y = jax.lax.conv_general_dilated(x, params["conv1_w"], (1, 1), "VALID",
                                     dimension_numbers=dn)
    y = jax.nn.relu(y + params["conv1_b"][None, :, None, None])
    y = jax.lax.reduce_window(y, -jnp.inf, jax.lax.max,
                              (1, 1, 2, 2), (1, 1, 2, 2), "VALID")
    y = jax.lax.conv_general_dilated(y, params["conv2_w"], (1, 1), "VALID",
                                     dimension_numbers=dn)
    y = jax.nn.relu(y + params["conv2_b"][None, :, None, None])
    y = jax.lax.reduce_window(y, -jnp.inf, jax.lax.max,
                              (1, 1, 2, 2), (1, 1, 2, 2), "VALID")
    y = y.reshape(y.shape[0], -1)
    y = jax.nn.relu(y @ params["fc1_w"].T + params["fc1_b"])
    y = jax.nn.relu(y @ params["fc2_w"].T + params["fc2_b"])
    return y @ params["out_w"].T + params["out_b"]


# ----------------------------------- main ------------------------------------

if __name__ == "__main__":
    key = jax.random.PRNGKey(0)
    k_in, k_par = jax.random.split(key)

    # MNIST-style input implied by fc1 (12*4*4 features): (B, 1, 28, 28)
    x = jax.random.normal(k_in, (2, 1, 28, 28), jnp.float32)
    params = init_params(k_par)
    tensors = prepare_weights(params)      # one-time weight rearrangement

    out = jax.block_until_ready(mynet_forward(tensors, x))
    assert out.shape == (2, 10), out.shape

    ref = jax.block_until_ready(ref_forward(params, x))
    err = float(jnp.max(jnp.abs(out - ref)))
    assert jnp.allclose(out, ref, atol=2e-3, rtol=2e-3), f"max abs err {err}"

    print("KERNEL_OK")
</pallas_src>

<mosaic_0001>
module attributes {stable_mosaic.version = 11 : i64} {
  func.func @_mynet_kernel(%arg0: i32, %arg1: memref<1x1x28x28xf32, #tpu.memory_space<vmem>>, %arg2: memref<5x28x144xf32, #tpu.memory_space<vmem>>, %arg3: memref<1x144xf32, #tpu.memory_space<vmem>>, %arg4: memref<2x12x24xf32, #tpu.memory_space<vmem>>, %arg5: memref<2x144x72xf32, #tpu.memory_space<vmem>>, %arg6: memref<5x72x96xf32, #tpu.memory_space<vmem>>, %arg7: memref<1x96xf32, #tpu.memory_space<vmem>>, %arg8: memref<2x4x8xf32, #tpu.memory_space<vmem>>, %arg9: memref<2x96x48xf32, #tpu.memory_space<vmem>>, %arg10: memref<4x48x120xf32, #tpu.memory_space<vmem>>, %arg11: memref<1x120xf32, #tpu.memory_space<vmem>>, %arg12: memref<120x60xf32, #tpu.memory_space<vmem>>, %arg13: memref<1x60xf32, #tpu.memory_space<vmem>>, %arg14: memref<60x10xf32, #tpu.memory_space<vmem>>, %arg15: memref<1x10xf32, #tpu.memory_space<vmem>>, %arg16: memref<1x1x10xf32, #tpu.memory_space<vmem>>) attributes {dimension_semantics = [#tpu.dimension_semantics<parallel>], iteration_bounds = array<i64: 2>, scalar_prefetch = 0 : i64, scratch_operands = 0 : i64, tpu.core_type = #tpu.core_type<tc>, window_params = [{transform_indices = @transform_0, window_bounds = array<i64: 1, 1, 28, 28>}, {pipeline_mode = #tpu.pipeline_mode<synchronous>, transform_indices = @transform_1, window_bounds = array<i64: 5, 28, 144>}, {pipeline_mode = #tpu.pipeline_mode<synchronous>, transform_indices = @transform_2, window_bounds = array<i64: 1, 144>}, {pipeline_mode = #tpu.pipeline_mode<synchronous>, transform_indices = @transform_3, window_bounds = array<i64: 2, 12, 24>}, {pipeline_mode = #tpu.pipeline_mode<synchronous>, transform_indices = @transform_4, window_bounds = array<i64: 2, 144, 72>}, {pipeline_mode = #tpu.pipeline_mode<synchronous>, transform_indices = @transform_5, window_bounds = array<i64: 5, 72, 96>}, {pipeline_mode = #tpu.pipeline_mode<synchronous>, transform_indices = @transform_6, window_bounds = array<i64: 1, 96>}, {pipeline_mode = #tpu.pipeline_mode<synchronous>, transform_indices = @transform_7, window_bounds = array<i64: 2, 4, 8>}, {pipeline_mode = #tpu.pipeline_mode<synchronous>, transform_indices = @transform_8, window_bounds = array<i64: 2, 96, 48>}, {pipeline_mode = #tpu.pipeline_mode<synchronous>, transform_indices = @transform_9, window_bounds = array<i64: 4, 48, 120>}, {pipeline_mode = #tpu.pipeline_mode<synchronous>, transform_indices = @transform_10, window_bounds = array<i64: 1, 120>}, {pipeline_mode = #tpu.pipeline_mode<synchronous>, transform_indices = @transform_11, window_bounds = array<i64: 120, 60>}, {pipeline_mode = #tpu.pipeline_mode<synchronous>, transform_indices = @transform_12, window_bounds = array<i64: 1, 60>}, {pipeline_mode = #tpu.pipeline_mode<synchronous>, transform_indices = @transform_13, window_bounds = array<i64: 60, 10>}, {pipeline_mode = #tpu.pipeline_mode<synchronous>, transform_indices = @transform_14, window_bounds = array<i64: 1, 10>}, {transform_indices = @transform_15, window_bounds = array<i64: 1, 1, 10>}]} {
    %c0 = arith.constant 0 : index
    %c0_0 = arith.constant 0 : index
    %c0_1 = arith.constant 0 : index
    %c0_2 = arith.constant 0 : index
    %0 = vector.load %arg1[%c0, %c0_0, %c0_1, %c0_2] : memref<1x1x28x28xf32, #tpu.memory_space<vmem>>, vector<1x1x28x28xf32>
    %1 = vector.shape_cast %0 : vector<1x1x28x28xf32> to vector<28x28xf32>
    %2 = vector.extract_strided_slice %1 {offsets = [0, 0], sizes = [24, 28], strides = [1, 1]} : vector<28x28xf32> to vector<24x28xf32>
    %c0_3 = arith.constant 0 : index
    %c0_4 = arith.constant 0 : index
    %c0_5 = arith.constant 0 : index
    %3 = vector.load %arg2[%c0_3, %c0_4, %c0_5] : memref<5x28x144xf32, #tpu.memory_space<vmem>>, vector<1x28x144xf32>
    %4 = vector.shape_cast %3 : vector<1x28x144xf32> to vector<28x144xf32>
    %cst = arith.constant dense<0.000000e+00> : vector<24x144xf32>
    %5 = tpu.matmul %2, %4, %cst {dimension_numbers = #tpu.dot_dimension_numbers<[1], [0], [0], [1], [0, 0, 1, 1], [], []>} : vector<24x28xf32>, vector<28x144xf32>, vector<24x144xf32> -> vector<24x144xf32>
    %6 = vector.extract_strided_slice %1 {offsets = [1, 0], sizes = [24, 28], strides = [1, 1]} : vector<28x28xf32> to vector<24x28xf32>
    %c1 = arith.constant 1 : index
    %c0_6 = arith.constant 0 : index
    %c0_7 = arith.constant 0 : index
    %7 = vector.load %arg2[%c1, %c0_6, %c0_7] : memref<5x28x144xf32, #tpu.memory_space<vmem>>, vector<1x28x144xf32>
    %8 = vector.shape_cast %7 : vector<1x28x144xf32> to vector<28x144xf32>
    %cst_8 = arith.constant dense<0.000000e+00> : vector<24x144xf32>
    %9 = tpu.matmul %6, %8, %cst_8 {dimension_numbers = #tpu.dot_dimension_numbers<[1], [0], [0], [1], [0, 0, 1, 1], [], []>} : vector<24x28xf32>, vector<28x144xf32>, vector<24x144xf32> -> vector<24x144xf32>
    %10 = arith.addf %5, %9 : vector<24x144xf32>
    %11 = vector.extract_strided_slice %1 {offsets = [2, 0], sizes = [24, 28], strides = [1, 1]} : vector<28x28xf32> to vector<24x28xf32>
    %c2 = arith.constant 2 : index
    %c0_9 = arith.constant 0 : index
    %c0_10 = arith.constant 0 : index
    %12 = vector.load %arg2[%c2, %c0_9, %c0_10] : memref<5x28x144xf32, #tpu.memory_space<vmem>>, vector<1x28x144xf32>
    %13 = vector.shape_cast %12 : vector<1x28x144xf32> to vector<28x144xf32>
    %cst_11 = arith.constant dense<0.000000e+00> : vector<24x144xf32>
    %14 = tpu.matmul %11, %13, %cst_11 {dimension_numbers = #tpu.dot_dimension_numbers<[1], [0], [0], [1], [0, 0, 1, 1], [], []>} : vector<24x28xf32>, vector<28x144xf32>, vector<24x144xf32> -> vector<24x144xf32>
    %15 = arith.addf %10, %14 : vector<24x144xf32>
    %16 = vector.extract_strided_slice %1 {offsets = [3, 0], sizes = [24, 28], strides = [1, 1]} : vector<28x28xf32> to vector<24x28xf32>
    %c3 = arith.constant 3 : index
    %c0_12 = arith.constant 0 : index
    %c0_13 = arith.constant 0 : index
    %17 = vector.load %arg2[%c3, %c0_12, %c0_13] : memref<5x28x144xf32, #tpu.memory_space<vmem>>, vector<1x28x144xf32>
    %18 = vector.shape_cast %17 : vector<1x28x144xf32> to vector<28x144xf32>
    %cst_14 = arith.constant dense<0.000000e+00> : vector<24x144xf32>
    %19 = tpu.matmul %16, %18, %cst_14 {dimension_numbers = #tpu.dot_dimension_numbers<[1], [0], [0], [1], [0, 0, 1, 1], [], []>} : vector<24x28xf32>, vector<28x144xf32>, vector<24x144xf32> -> vector<24x144xf32>
    %20 = arith.addf %15, %19 : vector<24x144xf32>
    %21 = vector.extract_strided_slice %1 {offsets = [4, 0], sizes = [24, 28], strides = [1, 1]} : vector<28x28xf32> to vector<24x28xf32>
    %c4 = arith.constant 4 : index
    %c0_15 = arith.constant 0 : index
    %c0_16 = arith.constant 0 : index
    %22 = vector.load %arg2[%c4, %c0_15, %c0_16] : memref<5x28x144xf32, #tpu.memory_space<vmem>>, vector<1x28x144xf32>
    %23 = vector.shape_cast %22 : vector<1x28x144xf32> to vector<28x144xf32>
    %cst_17 = arith.constant dense<0.000000e+00> : vector<24x144xf32>
    %24 = tpu.matmul %21, %23, %cst_17 {dimension_numbers = #tpu.dot_dimension_numbers<[1], [0], [0], [1], [0, 0, 1, 1], [], []>} : vector<24x28xf32>, vector<28x144xf32>, vector<24x144xf32> -> vector<24x144xf32>
    %25 = arith.addf %20, %24 : vector<24x144xf32>
    %c0_18 = arith.constant 0 : index
    %c0_19 = arith.constant 0 : index
    %26 = vector.load %arg3[%c0_18, %c0_19] : memref<1x144xf32, #tpu.memory_space<vmem>>, vector<1x144xf32>
    %27 = vector.broadcast %26 : vector<1x144xf32> to vector<24x144xf32>
    %28 = arith.addf %25, %27 : vector<24x144xf32>
    %cst_20 = arith.constant 0.000000e+00 : f32
    %29 = vector.broadcast %cst_20 : f32 to vector<24x144xf32>
    %30 = arith.maximumf %28, %29 : vector<24x144xf32>
    %c0_21 = arith.constant 0 : index
    %c0_22 = arith.constant 0 : index
    %c0_23 = arith.constant 0 : index
    %31 = vector.load %arg4[%c0_21, %c0_22, %c0_23] : memref<2x12x24xf32, #tpu.memory_space<vmem>>, vector<1x12x24xf32>
    %32 = vector.shape_cast %31 : vector<1x12x24xf32> to vector<12x24xf32>
    %cst_24 = arith.constant dense<0.000000e+00> : vector<12x144xf32>
    %33 = tpu.matmul %32, %30, %cst_24 {dimension_numbers = #tpu.dot_dimension_numbers<[1], [0], [0], [1], [0, 0, 1, 1], [], []>} : vector<12x24xf32>, vector<24x144xf32>, vector<12x144xf32> -> vector<12x144xf32>
    %c1_25 = arith.constant 1 : index
    %c0_26 = arith.constant 0 : index
    %c0_27 = arith.constant 0 : index
    %34 = vector.load %arg4[%c1_25, %c0_26, %c0_27] : memref<2x12x24xf32, #tpu.memory_space<vmem>>, vector<1x12x24xf32>
    %35 = vector.shape_cast %34 : vector<1x12x24xf32> to vector<12x24xf32>
    %cst_28 = arith.constant dense<0.000000e+00> : vector<12x144xf32>
    %36 = tpu.matmul %35, %30, %cst_28 {dimension_numbers = #tpu.dot_dimension_numbers<[1], [0], [0], [1], [0, 0, 1, 1], [], []>} : vector<12x24xf32>, vector<24x144xf32>, vector<12x144xf32> -> vector<12x144xf32>
    %37 = arith.maximumf %33, %36 : vector<12x144xf32>
    %c0_29 = arith.constant 0 : index
    %c0_30 = arith.constant 0 : index
    %c0_31 = arith.constant 0 : index
    %38 = vector.load %arg5[%c0_29, %c0_30, %c0_31] : memref<2x144x72xf32, #tpu.memory_space<vmem>>, vector<1x144x72xf32>
    %39 = vector.shape_cast %38 : vector<1x144x72xf32> to vector<144x72xf32>
    %cst_32 = arith.constant dense<0.000000e+00> : vector<12x72xf32>
    %40 = tpu.matmul %37, %39, %cst_32 {dimension_numbers = #tpu.dot_dimension_numbers<[1], [0], [0], [1], [0, 0, 1, 1], [], []>} : vector<12x144xf32>, vector<144x72xf32>, vector<12x72xf32> -> vector<12x72xf32>
    %c1_33 = arith.constant 1 : index
    %c0_34 = arith.constant 0 : index
    %c0_35 = arith.constant 0 : index
    %41 = vector.load %arg5[%c1_33, %c0_34, %c0_35] : memref<2x144x72xf32, #tpu.memory_space<vmem>>, vector<1x144x72xf32>
    %42 = vector.shape_cast %41 : vector<1x144x72xf32> to vector<144x72xf32>
    %cst_36 = arith.constant dense<0.000000e+00> : vector<12x72xf32>
    %43 = tpu.matmul %37, %42, %cst_36 {dimension_numbers = #tpu.dot_dimension_numbers<[1], [0], [0], [1], [0, 0, 1, 1], [], []>} : vector<12x144xf32>, vector<144x72xf32>, vector<12x72xf32> -> vector<12x72xf32>
    %44 = arith.maximumf %40, %43 : vector<12x72xf32>
    %45 = vector.extract_strided_slice %44 {offsets = [0, 0], sizes = [8, 72], strides = [1, 1]} : vector<12x72xf32> to vector<8x72xf32>
    %c0_37 = arith.constant 0 : index
    %c0_38 = arith.constant 0 : index
    %c0_39 = arith.constant 0 : index
    %46 = vector.load %arg6[%c0_37, %c0_38, %c0_39] : memref<5x72x96xf32, #tpu.memory_space<vmem>>, vector<1x72x96xf32>
    %47 = vector.shape_cast %46 : vector<1x72x96xf32> to vector<72x96xf32>
    %cst_40 = arith.constant dense<0.000000e+00> : vector<8x96xf32>
    %48 = tpu.matmul %45, %47, %cst_40 {dimension_numbers = #tpu.dot_dimension_numbers<[1], [0], [0], [1], [0, 0, 1, 1], [], []>} : vector<8x72xf32>, vector<72x96xf32>, vector<8x96xf32> -> vector<8x96xf32>
    %49 = vector.extract_strided_slice %44 {offsets = [1, 0], sizes = [8, 72], strides = [1, 1]} : vector<12x72xf32> to vector<8x72xf32>
    %c1_41 = arith.constant 1 : index
    %c0_42 = arith.constant 0 : index
    %c0_43 = arith.constant 0 : index
    %50 = vector.load %arg6[%c1_41, %c0_42, %c0_43] : memref<5x72x96xf32, #tpu.memory_space<vmem>>, vector<1x72x96xf32>
    %51 = vector.shape_cast %50 : vector<1x72x96xf32> to vector<72x96xf32>
    %cst_44 = arith.constant dense<0.000000e+00> : vector<8x96xf32>
    %52 = tpu.matmul %49, %51, %cst_44 {dimension_numbers = #tpu.dot_dimension_numbers<[1], [0], [0], [1], [0, 0, 1, 1], [], []>} : vector<8x72xf32>, vector<72x96xf32>, vector<8x96xf32> -> vector<8x96xf32>
    %53 = arith.addf %48, %52 : vector<8x96xf32>
    %54 = vector.extract_strided_slice %44 {offsets = [2, 0], sizes = [8, 72], strides = [1, 1]} : vector<12x72xf32> to vector<8x72xf32>
    %c2_45 = arith.constant 2 : index
    %c0_46 = arith.constant 0 : index
    %c0_47 = arith.constant 0 : index
    %55 = vector.load %arg6[%c2_45, %c0_46, %c0_47] : memref<5x72x96xf32, #tpu.memory_space<vmem>>, vector<1x72x96xf32>
    %56 = vector.shape_cast %55 : vector<1x72x96xf32> to vector<72x96xf32>
    %cst_48 = arith.constant dense<0.000000e+00> : vector<8x96xf32>
    %57 = tpu.matmul %54, %56, %cst_48 {dimension_numbers = #tpu.dot_dimension_numbers<[1], [0], [0], [1], [0, 0, 1, 1], [], []>} : vector<8x72xf32>, vector<72x96xf32>, vector<8x96xf32> -> vector<8x96xf32>
    %58 = arith.addf %53, %57 : vector<8x96xf32>
    %59 = vector.extract_strided_slice %44 {offsets = [3, 0], sizes = [8, 72], strides = [1, 1]} : vector<12x72xf32> to vector<8x72xf32>
    %c3_49 = arith.constant 3 : index
    %c0_50 = arith.constant 0 : index
    %c0_51 = arith.constant 0 : index
    %60 = vector.load %arg6[%c3_49, %c0_50, %c0_51] : memref<5x72x96xf32, #tpu.memory_space<vmem>>, vector<1x72x96xf32>
    %61 = vector.shape_cast %60 : vector<1x72x96xf32> to vector<72x96xf32>
    %cst_52 = arith.constant dense<0.000000e+00> : vector<8x96xf32>
    %62 = tpu.matmul %59, %61, %cst_52 {dimension_numbers = #tpu.dot_dimension_numbers<[1], [0], [0], [1], [0, 0, 1, 1], [], []>} : vector<8x72xf32>, vector<72x96xf32>, vector<8x96xf32> -> vector<8x96xf32>
    %63 = arith.addf %58, %62 : vector<8x96xf32>
    %64 = vector.extract_strided_slice %44 {offsets = [4, 0], sizes = [8, 72], strides = [1, 1]} : vector<12x72xf32> to vector<8x72xf32>
    %c4_53 = arith.constant 4 : index
    %c0_54 = arith.constant 0 : index
    %c0_55 = arith.constant 0 : index
    %65 = vector.load %arg6[%c4_53, %c0_54, %c0_55] : memref<5x72x96xf32, #tpu.memory_space<vmem>>, vector<1x72x96xf32>
    %66 = vector.shape_cast %65 : vector<1x72x96xf32> to vector<72x96xf32>
    %cst_56 = arith.constant dense<0.000000e+00> : vector<8x96xf32>
    %67 = tpu.matmul %64, %66, %cst_56 {dimension_numbers = #tpu.dot_dimension_numbers<[1], [0], [0], [1], [0, 0, 1, 1], [], []>} : vector<8x72xf32>, vector<72x96xf32>, vector<8x96xf32> -> vector<8x96xf32>
    %68 = arith.addf %63, %67 : vector<8x96xf32>
    %c0_57 = arith.constant 0 : index
    %c0_58 = arith.constant 0 : index
    %69 = vector.load %arg7[%c0_57, %c0_58] : memref<1x96xf32, #tpu.memory_space<vmem>>, vector<1x96xf32>
    %70 = vector.broadcast %69 : vector<1x96xf32> to vector<8x96xf32>
    %71 = arith.addf %68, %70 : vector<8x96xf32>
    %cst_59 = arith.constant 0.000000e+00 : f32
    %72 = vector.broadcast %cst_59 : f32 to vector<8x96xf32>
    %73 = arith.maximumf %71, %72 : vector<8x96xf32>
    %c0_60 = arith.constant 0 : index
    %c0_61 = arith.constant 0 : index
    %c0_62 = arith.constant 0 : index
    %74 = vector.load %arg8[%c0_60, %c0_61, %c0_62] : memref<2x4x8xf32, #tpu.memory_space<vmem>>, vector<1x4x8xf32>
    %75 = vector.shape_cast %74 : vector<1x4x8xf32> to vector<4x8xf32>
    %cst_63 = arith.constant dense<0.000000e+00> : vector<4x96xf32>
    %76 = tpu.matmul %75, %73, %cst_63 {dimension_numbers = #tpu.dot_dimension_numbers<[1], [0], [0], [1], [0, 0, 1, 1], [], []>} : vector<4x8xf32>, vector<8x96xf32>, vector<4x96xf32> -> vector<4x96xf32>
    %c1_64 = arith.constant 1 : index
    %c0_65 = arith.constant 0 : index
    %c0_66 = arith.constant 0 : index
    %77 = vector.load %arg8[%c1_64, %c0_65, %c0_66] : memref<2x4x8xf32, #tpu.memory_space<vmem>>, vector<1x4x8xf32>
    %78 = vector.shape_cast %77 : vector<1x4x8xf32> to vector<4x8xf32>
    %cst_67 = arith.constant dense<0.000000e+00> : vector<4x96xf32>
    %79 = tpu.matmul %78, %73, %cst_67 {dimension_numbers = #tpu.dot_dimension_numbers<[1], [0], [0], [1], [0, 0, 1, 1], [], []>} : vector<4x8xf32>, vector<8x96xf32>, vector<4x96xf32> -> vector<4x96xf32>
    %80 = arith.maximumf %76, %79 : vector<4x96xf32>
    %c0_68 = arith.constant 0 : index
    %c0_69 = arith.constant 0 : index
    %c0_70 = arith.constant 0 : index
    %81 = vector.load %arg9[%c0_68, %c0_69, %c0_70] : memref<2x96x48xf32, #tpu.memory_space<vmem>>, vector<1x96x48xf32>
    %82 = vector.shape_cast %81 : vector<1x96x48xf32> to vector<96x48xf32>
    %cst_71 = arith.constant dense<0.000000e+00> : vector<4x48xf32>
    %83 = tpu.matmul %80, %82, %cst_71 {dimension_numbers = #tpu.dot_dimension_numbers<[1], [0], [0], [1], [0, 0, 1, 1], [], []>} : vector<4x96xf32>, vector<96x48xf32>, vector<4x48xf32> -> vector<4x48xf32>
    %c1_72 = arith.constant 1 : index
    %c0_73 = arith.constant 0 : index
    %c0_74 = arith.constant 0 : index
    %84 = vector.load %arg9[%c1_72, %c0_73, %c0_74] : memref<2x96x48xf32, #tpu.memory_space<vmem>>, vector<1x96x48xf32>
    %85 = vector.shape_cast %84 : vector<1x96x48xf32> to vector<96x48xf32>
    %cst_75 = arith.constant dense<0.000000e+00> : vector<4x48xf32>
    %86 = tpu.matmul %80, %85, %cst_75 {dimension_numbers = #tpu.dot_dimension_numbers<[1], [0], [0], [1], [0, 0, 1, 1], [], []>} : vector<4x96xf32>, vector<96x48xf32>, vector<4x48xf32> -> vector<4x48xf32>
    %87 = arith.maximumf %83, %86 : vector<4x48xf32>
    %c0_76 = arith.constant 0 : index
    %c0_77 = arith.constant 0 : index
    %88 = vector.load %arg11[%c0_76, %c0_77] : memref<1x120xf32, #tpu.memory_space<vmem>>, vector<1x120xf32>
    %89 = vector.extract_strided_slice %87 {offsets = [0, 0], sizes = [1, 48], strides = [1, 1]} : vector<4x48xf32> to vector<1x48xf32>
    %c0_78 = arith.constant 0 : index
    %c0_79 = arith.constant 0 : index
    %c0_80 = arith.constant 0 : index
    %90 = vector.load %arg10[%c0_78, %c0_79, %c0_80] : memref<4x48x120xf32, #tpu.memory_space<vmem>>, vector<1x48x120xf32>
    %91 = vector.shape_cast %90 : vector<1x48x120xf32> to vector<48x120xf32>
    %cst_81 = arith.constant dense<0.000000e+00> : vector<1x120xf32>
    %92 = tpu.matmul %89, %91, %cst_81 {dimension_numbers = #tpu.dot_dimension_numbers<[1], [0], [0], [1], [0, 0, 1, 1], [], []>} : vector<1x48xf32>, vector<48x120xf32>, vector<1x120xf32> -> vector<1x120xf32>
    %93 = arith.addf %88, %92 : vector<1x120xf32>
    %94 = vector.extract_strided_slice %87 {offsets = [1, 0], sizes = [1, 48], strides = [1, 1]} : vector<4x48xf32> to vector<1x48xf32>
    %c1_82 = arith.constant 1 : index
    %c0_83 = arith.constant 0 : index
    %c0_84 = arith.constant 0 : index
    %95 = vector.load %arg10[%c1_82, %c0_83, %c0_84] : memref<4x48x120xf32, #tpu.memory_space<vmem>>, vector<1x48x120xf32>
    %96 = vector.shape_cast %95 : vector<1x48x120xf32> to vector<48x120xf32>
    %cst_85 = arith.constant dense<0.000000e+00> : vector<1x120xf32>
    %97 = tpu.matmul %94, %96, %cst_85 {dimension_numbers = #tpu.dot_dimension_numbers<[1], [0], [0], [1], [0, 0, 1, 1], [], []>} : vector<1x48xf32>, vector<48x120xf32>, vector<1x120xf32> -> vector<1x120xf32>
    %98 = arith.addf %93, %97 : vector<1x120xf32>
    %99 = vector.extract_strided_slice %87 {offsets = [2, 0], sizes = [1, 48], strides = [1, 1]} : vector<4x48xf32> to vector<1x48xf32>
    %c2_86 = arith.constant 2 : index
    %c0_87 = arith.constant 0 : index
    %c0_88 = arith.constant 0 : index
    %100 = vector.load %arg10[%c2_86, %c0_87, %c0_88] : memref<4x48x120xf32, #tpu.memory_space<vmem>>, vector<1x48x120xf32>
    %101 = vector.shape_cast %100 : vector<1x48x120xf32> to vector<48x120xf32>
    %cst_89 = arith.constant dense<0.000000e+00> : vector<1x120xf32>
    %102 = tpu.matmul %99, %101, %cst_89 {dimension_numbers = #tpu.dot_dimension_numbers<[1], [0], [0], [1], [0, 0, 1, 1], [], []>} : vector<1x48xf32>, vector<48x120xf32>, vector<1x120xf32> -> vector<1x120xf32>
    %103 = arith.addf %98, %102 : vector<1x120xf32>
    %104 = vector.extract_strided_slice %87 {offsets = [3, 0], sizes = [1, 48], strides = [1, 1]} : vector<4x48xf32> to vector<1x48xf32>
    %c3_90 = arith.constant 3 : index
    %c0_91 = arith.constant 0 : index
    %c0_92 = arith.constant 0 : index
    %105 = vector.load %arg10[%c3_90, %c0_91, %c0_92] : memref<4x48x120xf32, #tpu.memory_space<vmem>>, vector<1x48x120xf32>
    %106 = vector.shape_cast %105 : vector<1x48x120xf32> to vector<48x120xf32>
    %cst_93 = arith.constant dense<0.000000e+00> : vector<1x120xf32>
    %107 = tpu.matmul %104, %106, %cst_93 {dimension_numbers = #tpu.dot_dimension_numbers<[1], [0], [0], [1], [0, 0, 1, 1], [], []>} : vector<1x48xf32>, vector<48x120xf32>, vector<1x120xf32> -> vector<1x120xf32>
    %108 = arith.addf %103, %107 : vector<1x120xf32>
    %cst_94 = arith.constant 0.000000e+00 : f32
    %109 = vector.broadcast %cst_94 : f32 to vector<1x120xf32>
    %110 = arith.maximumf %108, %109 : vector<1x120xf32>
    %c0_95 = arith.constant 0 : index
    %c0_96 = arith.constant 0 : index
    %111 = vector.load %arg12[%c0_95, %c0_96] : memref<120x60xf32, #tpu.memory_space<vmem>>, vector<120x60xf32>
    %cst_97 = arith.constant dense<0.000000e+00> : vector<1x60xf32>
    %112 = tpu.matmul %110, %111, %cst_97 {dimension_numbers = #tpu.dot_dimension_numbers<[1], [0], [0], [1], [0, 0, 1, 1], [], []>} : vector<1x120xf32>, vector<120x60xf32>, vector<1x60xf32> -> vector<1x60xf32>
    %c0_98 = arith.constant 0 : index
    %c0_99 = arith.constant 0 : index
    %113 = vector.load %arg13[%c0_98, %c0_99] : memref<1x60xf32, #tpu.memory_space<vmem>>, vector<1x60xf32>
    %114 = arith.addf %112, %113 : vector<1x60xf32>
    %cst_100 = arith.constant 0.000000e+00 : f32
    %115 = vector.broadcast %cst_100 : f32 to vector<1x60xf32>
    %116 = arith.maximumf %114, %115 : vector<1x60xf32>
    %c0_101 = arith.constant 0 : index
    %c0_102 = arith.constant 0 : index
    %117 = vector.load %arg14[%c0_101, %c0_102] : memref<60x10xf32, #tpu.memory_space<vmem>>, vector<60x10xf32>
    %cst_103 = arith.constant dense<0.000000e+00> : vector<1x10xf32>
    %118 = tpu.matmul %116, %117, %cst_103 {dimension_numbers = #tpu.dot_dimension_numbers<[1], [0], [0], [1], [0, 0, 1, 1], [], []>} : vector<1x60xf32>, vector<60x10xf32>, vector<1x10xf32> -> vector<1x10xf32>
    %c0_104 = arith.constant 0 : index
    %c0_105 = arith.constant 0 : index
    %119 = vector.load %arg15[%c0_104, %c0_105] : memref<1x10xf32, #tpu.memory_space<vmem>>, vector<1x10xf32>
    %120 = arith.addf %118, %119 : vector<1x10xf32>
    %c0_106 = arith.constant 0 : index
    %c0_107 = arith.constant 0 : index
    %c0_108 = arith.constant 0 : index
    %121 = vector.load %arg16[%c0_106, %c0_107, %c0_108] : memref<1x1x10xf32, #tpu.memory_space<vmem>>, vector<1x1x10xf32>
    %122 = vector.shape_cast %121 : vector<1x1x10xf32> to vector<1x10xf32>
    %123 = vector.shape_cast %120 : vector<1x10xf32> to vector<1x1x10xf32>
    tpu.vector_store %arg16[%c0_106, %c0_107, %c0_108], %123 {strides = array<i32>} : memref<1x1x10xf32, #tpu.memory_space<vmem>>, vector<1x1x10xf32>,
    return
  }
  func.func @transform_0(%arg0: i32) -> (i32, i32, i32, i32) {
    %c0_i32 = arith.constant 0 : i32
    %c0_i32_0 = arith.constant 0 : i32
    %c0_i32_1 = arith.constant 0 : i32
    %c0_i32_2 = arith.constant 0 : i32
    return %arg0, %c0_i32, %c0_i32_0, %c0_i32_1 : i32, i32, i32, i32
  }
  func.func @transform_1(%arg0: i32) -> (i32, i32, i32) {
    %c0_i32 = arith.constant 0 : i32
    %c0_i32_0 = arith.constant 0 : i32
    %c0_i32_1 = arith.constant 0 : i32
    %c0_i32_2 = arith.constant 0 : i32
    return %c0_i32, %c0_i32_0, %c0_i32_1 : i32, i32, i32
  }
  func.func @transform_2(%arg0: i32) -> (i32, i32) {
    %c0_i32 = arith.constant 0 : i32
    %c0_i32_0 = arith.constant 0 : i32
    %c0_i32_1 = arith.constant 0 : i32
    return %c0_i32, %c0_i32_0 : i32, i32
  }
  func.func @transform_3(%arg0: i32) -> (i32, i32, i32) {
    %c0_i32 = arith.constant 0 : i32
    %c0_i32_0 = arith.constant 0 : i32
    %c0_i32_1 = arith.constant 0 : i32
    %c0_i32_2 = arith.constant 0 : i32
    return %c0_i32, %c0_i32_0, %c0_i32_1 : i32, i32, i32
  }
  func.func @transform_4(%arg0: i32) -> (i32, i32, i32) {
    %c0_i32 = arith.constant 0 : i32
    %c0_i32_0 = arith.constant 0 : i32
    %c0_i32_1 = arith.constant 0 : i32
    %c0_i32_2 = arith.constant 0 : i32
    return %c0_i32, %c0_i32_0, %c0_i32_1 : i32, i32, i32
  }
  func.func @transform_5(%arg0: i32) -> (i32, i32, i32) {
    %c0_i32 = arith.constant 0 : i32
    %c0_i32_0 = arith.constant 0 : i32
    %c0_i32_1 = arith.constant 0 : i32
    %c0_i32_2 = arith.constant 0 : i32
    return %c0_i32, %c0_i32_0, %c0_i32_1 : i32, i32, i32
  }
  func.func @transform_6(%arg0: i32) -> (i32, i32) {
    %c0_i32 = arith.constant 0 : i32
    %c0_i32_0 = arith.constant 0 : i32
    %c0_i32_1 = arith.constant 0 : i32
    return %c0_i32, %c0_i32_0 : i32, i32
  }
  func.func @transform_7(%arg0: i32) -> (i32, i32, i32) {
    %c0_i32 = arith.constant 0 : i32
    %c0_i32_0 = arith.constant 0 : i32
    %c0_i32_1 = arith.constant 0 : i32
    %c0_i32_2 = arith.constant 0 : i32
    return %c0_i32, %c0_i32_0, %c0_i32_1 : i32, i32, i32
  }
  func.func @transform_8(%arg0: i32) -> (i32, i32, i32) {
    %c0_i32 = arith.constant 0 : i32
    %c0_i32_0 = arith.constant 0 : i32
    %c0_i32_1 = arith.constant 0 : i32
    %c0_i32_2 = arith.constant 0 : i32
    return %c0_i32, %c0_i32_0, %c0_i32_1 : i32, i32, i32
  }
  func.func @transform_9(%arg0: i32) -> (i32, i32, i32) {
    %c0_i32 = arith.constant 0 : i32
    %c0_i32_0 = arith.constant 0 : i32
    %c0_i32_1 = arith.constant 0 : i32
    %c0_i32_2 = arith.constant 0 : i32
    return %c0_i32, %c0_i32_0, %c0_i32_1 : i32, i32, i32
  }
  func.func @transform_10(%arg0: i32) -> (i32, i32) {
    %c0_i32 = arith.constant 0 : i32
    %c0_i32_0 = arith.constant 0 : i32
    %c0_i32_1 = arith.constant 0 : i32
    return %c0_i32, %c0_i32_0 : i32, i32
  }
  func.func @transform_11(%arg0: i32) -> (i32, i32) {
    %c0_i32 = arith.constant 0 : i32
    %c0_i32_0 = arith.constant 0 : i32
    %c0_i32_1 = arith.constant 0 : i32
    return %c0_i32, %c0_i32_0 : i32, i32
  }
  func.func @transform_12(%arg0: i32) -> (i32, i32) {
    %c0_i32 = arith.constant 0 : i32
    %c0_i32_0 = arith.constant 0 : i32
    %c0_i32_1 = arith.constant 0 : i32
    return %c0_i32, %c0_i32_0 : i32, i32
  }
  func.func @transform_13(%arg0: i32) -> (i32, i32) {
    %c0_i32 = arith.constant 0 : i32
    %c0_i32_0 = arith.constant 0 : i32
    %c0_i32_1 = arith.constant 0 : i32
    return %c0_i32, %c0_i32_0 : i32, i32
  }
  func.func @transform_14(%arg0: i32) -> (i32, i32) {
    %c0_i32 = arith.constant 0 : i32
    %c0_i32_0 = arith.constant 0 : i32
    %c0_i32_1 = arith.constant 0 : i32
    return %c0_i32, %c0_i32_0 : i32, i32
  }
  func.func @transform_15(%arg0: i32) -> (i32, i32, i32) {
    %c0_i32 = arith.constant 0 : i32
    %c0_i32_0 = arith.constant 0 : i32
    %c0_i32_1 = arith.constant 0 : i32
    return %arg0, %c0_i32, %c0_i32_0 : i32, i32, i32
  }
}

</mosaic_0001>

<bundles_post_ra>
// kernel: mynet_forward.1
= control target key start
LH: loop header
LB: loop body
LE: loop exit
PB: predicated region body
PF: predicated region fallthrough
CT: control target
= control target key end

     0   :  { %s4847_s0 = inlined_call_operand.vmem [shape: f32[2,1,28,28], index: 0, kind: input, shape index: {}]   ;;  %s4848_s1 = inlined_call_operand.vmem [shape: f32[5,28,144], index: 1, kind: input, shape index: {}]   ;;  %s4849_s2 = inlined_call_operand.hbm [shape: f32[1,144], index: 2, kind: input, shape index: {}]   ;;  %s4850_s3 = inlined_call_operand.vmem [shape: f32[2,12,24], index: 3, kind: input, shape index: {}]   ;;  %s4851_s4 = inlined_call_operand.hbm [shape: f32[2,144,72], index: 4, kind: input, shape index: {}]   ;;  %s4852_s5 = inlined_call_operand.vmem [shape: f32[5,72,96], index: 5, kind: input, shape index: {}]   ;;  %s4853_s6 = inlined_call_operand.vmem [shape: f32[1,96], index: 6, kind: input, shape index: {}]   ;;  %s4854_s7 = inlined_call_operand.vmem [shape: f32[2,4,8], index: 7, kind: input, shape index: {}]   ;;  %s4855_s8 = inlined_call_operand.vmem [shape: f32[2,96,48], index: 8, kind: input, shape index: {}]   ;;  %s4856_s9 = inlined_call_operand.hbm [shape: f32[4,48,120], index: 9, kind: input, shape index: {}]   ;;  %s4857_s10 = inlined_call_operand.hbm [shape: f32[1,120], index: 10, kind: input, shape index: {}]   ;;  %s4858_s11 = inlined_call_operand.vmem [shape: f32[120,60], index: 11, kind: input, shape index: {}]   ;;  %s4859_s12 = inlined_call_operand.hbm [shape: f32[1,60], index: 12, kind: input, shape index: {}]   ;;  %s4860_s13 = inlined_call_operand.vmem [shape: f32[60,10], index: 13, kind: input, shape index: {}]   ;;  %s4861_s14 = inlined_call_operand.hbm [shape: f32[1,10], index: 14, kind: input, shape index: {}]   ;;  %s4862_s15 = inlined_call_operand.hbm [shape: f32[2,1,10], index: 15, kind: output, shape index: {}]  }
   0x1   :  { %4875 = sst [smem:[#allocation26_spill]] %s4862_s15 }
   0x2   :  { %20 = vsyncpa [#allocation3], 0 }
   0x3   :  { %21 = vsyncpa [#allocation6], 0 }
   0x4   :  { %22 = vsyncpa [#allocation9], 0 }
   0x5   :  { %23 = vsyncpa [#allocation12], 0 }
   0x6   :  { %24 = vsyncpa [#allocation4], 0 }
   0x7   :  { %26 = vsyncpa [#allocation4 + $0x1], 0  ;;  %s3942_s18 = smov 0   ;;  %s3944_s19 = smov 0  }
   0x8   :  { %s3946_s20 = smov 0   ;;  %s3948_s21 = smov 0  }
   0x9 LB: > { %4876 = sst [smem:[#allocation19_spill]] %s3837_s18  ;;  %s3963_s22 = sadd.s32 4294967295, %s3849_s21   ;;  %s3849_s21 = sphi %s3948_s21, %s4904_s21   ;;  %s3845_s20 = sphi %s3946_s20, %s4906_s20   ;;  %s3841_s19 = sphi %s3944_s19, %s4908_s19   ;;  %s3837_s18 = sphi %s3942_s18, %s4907_s18  }
   0xa   : > { %4877 = sst [smem:[#allocation20_spill]] %s3845_s20  ;;  %s2936_s23 = sadd.s32 4294967294, %s3849_s21  }
   0xb   : > { %4878 = sst [smem:[#allocation21_spill]] %s3849_s21  ;;  %s3967_s24 = sadd.s32 1, %s3849_s21  }
   0xc   : > { %4879 = sst [smem:[#allocation22_spill]] %s3967_s24  ;;  %s359_s25 = sadd.s32 1, %s3845_s20 }
   0xd   : > { %s356_s26 = ssub.s32 %s3849_s21, %s3967_s24  ;;  %p369_p0 = scmp.ne.s32.totalorder %s3845_s20, %s3841_s19 }
   0xe   : > { %p357_p1 = scmp.eq.s32.totalorder %s356_s26, 0  ;;  %p370_p2 = scmp.eq.s32.totalorder %s3963_s22, 1 }
   0xf   : > { %p375_p3 = scmp.ne.s32.totalorder %s3841_s19, %s3837_s18  ;;  %p376_p4 = scmp.eq.s32.totalorder %s2936_s23, 1 }
  0x10   : > { %s3978_s27 = scalar_select %p357_p1, %s3845_s20, %s359_s25  }
  0x11   : > { %p3980_p5 = por %p370_p2, %p369_p0  ;;  %p3984_p6 = por %p376_p4, %p375_p3 }
  0x12   : > { %4880 = sst [smem:[#allocation23_spill]] %s3978_s27  ;;  %p2937_p7 = scmp.ge.s32.totalorder %s3849_s21, 1 }
  0x13   : > { %s4881_s28 = scalar_select %p3980_p5, 1, 0 }
  0x14   : > { %s4883_s29 = scalar_select %p3984_p6, 1, 0 }
  0x15   : > { %4882 = sst [smem:[#allocation24_spill]] %s4881_s28  ;;  %p383_p8 = scmp.lt.s32.totalorder %s3849_s21, 3 }
  0x16   : > { %4884 = sst [smem:[#allocation25_spill]] %s4883_s29  ;;  %p4872_p9 = scmp.eq.s32.totalorder %s3963_s22, 0 }
  0x17   : > { %p3991_p10 = pnand %p2937_p7, %p383_p8  ;;  %s3851_s16 = smov [#allocation5]  }
  0x18   : > { %s412_s17 = sshll.u32 %s3851_s16, 4  ;;  %s3852_s25 = smov [#allocation8]   ;;  %s413_s17 = int_to_ptr.vmem [resolvable:$true] %s412_s17 }
  0x19   : > { %s4885_s30 = scalar_select %p3991_p10, 1, 0 }
  0x1a   : > { %p3539_p11 = pneg %p3991_p10  ;;  %s451_s26 = sshll.u32 %s3852_s25, 4  ;;  %s452_s26 = int_to_ptr.vmem [resolvable:$true] %s451_s26 }
  0x1b   : > { %s3853_s27 = smov [#allocation2]   ;;  %s3628_s16 = scalar_lea.vmem %s413_s17, 4608 }
  0x1c   : > { %p3999_p12 = pnand %p4872_p9, %p3539_p11  ;;  %s399_s20 = sshll.u32 %s3853_s27, 4  ;;  %s400_s20 = int_to_ptr.vmem [resolvable:$true] %s399_s20 }
  0x1d   : > { %p3629_p0 = scmp.ne.s32.totalorder %s413_s17, %s3628_s16  ;;  %p3636_p3 = scmp.lt.s32.totalorder %s413_s17, %s413_s17 }
  0x1e   : > { %p4005_p13 = pneg %p3999_p12  ;;  %p3637_p4 = scmp.lt.s32.totalorder %s3628_s16, %s3628_s16 }
  0x20   : > { %p3631_p1 = pnand %p3629_p0, %p4005_p13  ;;  %p3638_p7 = por %p3637_p4, %p3636_p3 }
  0x22   : > { %p3632_p2 = pneg %p3631_p1 }
  0x24   : > { %p3639_p8 = pnand %p3638_p7, %p3632_p2 }
  0x26   : > { %3642 = shalt.err (!%p3639_p8)
}
  0x27   : > { %s3854_s25 = smov 128   ;;  %s3855_s27 = smov 8  }
  0x28   : > { %3545 = dma.hbm_to_vmem [thread:$0]  (!%p3999_p12), %s4851_s4, 4608, %s413_s17, [#allocation6], %s3854_s25, %s3854_s25, %s3855_s27  }
  0x29   : > { %s3654_s21 = scalar_lea.vmem %s452_s26, 16  ;;  %s3661_s16 = scalar_lea.vmem %s452_s26, 32 }
  0x2a   : > { %p3655_p11 = scmp.ne.s32.totalorder %s452_s26, %s3654_s21  ;;  %p3662_p2 = scmp.lt.s32.totalorder %s452_s26, %s452_s26 }
  0x2b   : > { %p3663_p3 = scmp.lt.s32.totalorder %s3661_s16, %s3654_s21 }
  0x2c   : > { %p3657_p0 = pnand %p3655_p11, %p4005_p13 }
  0x2d   : > { %p3664_p4 = por %p3663_p3, %p3662_p2 }
  0x2e   : > { %p3658_p1 = pneg %p3657_p0 }
  0x30   : > { %p3665_p7 = pnand %p3664_p4, %p3658_p1 }
  0x32   : > { %3668 = shalt.err (!%p3665_p7)
}
  0x33   : > { %3551 = dma.hbm_to_vmem [thread:$0]  (!%p3999_p12), %s4857_s10, 16, %s452_s26, [#allocation9]  }
  0x34   : > { %s3680_s18 = scalar_lea.vmem %s400_s20, 32  ;;  %p3688_p0 = scmp.lt.s32.totalorder %s400_s20, %s400_s20 }
  0x35   : > { %p3681_p8 = scmp.ne.s32.totalorder %s400_s20, %s3680_s18  ;;  %p3689_p6 = scmp.lt.s32.totalorder %s3680_s18, %s3680_s18 }
  0x37   : > { %p3683_p9 = pnand %p3681_p8, %p4005_p13  ;;  %p3690_p5 = por %p3689_p6, %p3688_p0 }
  0x39   : > { %p3684_p11 = pneg %p3683_p9 }
  0x3b   : > { %p3691_p10 = pnand %p3690_p5, %p3684_p11 }
  0x3d   : > { %3694 = shalt.err (!%p3691_p10)
}
  0x3e   : > { %3542 = dma.hbm_to_vmem [thread:$0]  (!%p3999_p12), %s4849_s2, 32, %s400_s20, [#allocation3]  }
  0x3f   : > { %s3856_s15 = smov [#allocation7]   ;;  %s3857_s17 = smov [#allocation10]  }
  0x40   : > { %s437_s28 = sshll.u32 %s3856_s15, 4  ;;  %s465_s26 = sshll.u32 %s3857_s17, 4  ;;  %s438_s28 = int_to_ptr.vmem [resolvable:$true] %s437_s28  ;;  %s466_s26 = int_to_ptr.vmem [resolvable:$true] %s465_s26 }
  0x41   : > { %s3706_s16 = scalar_lea.vmem %s438_s28, 3072  ;;  %p3714_p6 = scmp.lt.s32.totalorder %s438_s28, %s438_s28 }
  0x42   : > { %p3707_p1 = scmp.ne.s32.totalorder %s438_s28, %s3706_s16  ;;  %p3715_p5 = scmp.lt.s32.totalorder %s3706_s16, %s3706_s16 }
  0x44   : > { %p3709_p9 = pnand %p3707_p1, %p4005_p13  ;;  %p3716_p10 = por %p3715_p5, %p3714_p6 }
  0x46   : > { %p3710_p2 = pneg %p3709_p9 }
  0x48   : > { %p3717_p3 = pnand %p3716_p10, %p3710_p2 }
  0x4a   : > { %3720 = shalt.err (!%p3717_p3)
}
  0x4b   : > { %3548 = dma.hbm_to_vmem [thread:$0]  (!%p3999_p12), %s4856_s9, 3072, %s438_s28, [#allocation6], %s3854_s25, %s3854_s25, %s3855_s27  }
  0x4c   : > { %s3732_s21 = scalar_lea.vmem %s466_s26, 16  ;;  %s3739_s29 = scalar_lea.vmem %s466_s26, 32 }
  0x4d   : > { %p3733_p4 = scmp.ne.s32.totalorder %s466_s26, %s3732_s21  ;;  %p3740_p11 = scmp.lt.s32.totalorder %s466_s26, %s466_s26 }
  0x4e   : > { %p3741_p0 = scmp.lt.s32.totalorder %s3739_s29, %s3732_s21 }
  0x4f   : > { %p3735_p7 = pnand %p3733_p4, %p4005_p13 }
  0x50   : > { %p3742_p1 = por %p3741_p0, %p3740_p11 }
  0x51   : > { %p3736_p8 = pneg %p3735_p7 }
  0x53   : > { %p3743_p9 = pnand %p3742_p1, %p3736_p8 }
  0x55   : > { %3746 = shalt.err (!%p3743_p9)
}
  0x56   : > { %3554 = dma.hbm_to_vmem [thread:$0]  (!%p3999_p12), %s4859_s12, 16, %s466_s26, [#allocation9]  }
  0x57   : > { %s3858_s25 = smov [#allocation11]  }
  0x58   : > { %s479_s27 = sshll.u32 %s3858_s25, 4  ;;  %s480_s27 = int_to_ptr.vmem [resolvable:$true] %s479_s27 }
  0x59   : > { %s3758_s28 = scalar_lea.vmem %s480_s27, 16  ;;  %s3765_s16 = scalar_lea.vmem %s480_s27, 32 }
  0x5a   : > { %p3759_p2 = scmp.ne.s32.totalorder %s480_s27, %s3758_s28  ;;  %p3766_p10 = scmp.lt.s32.totalorder %s480_s27, %s480_s27 }
  0x5b   : > { %p3767_p3 = scmp.lt.s32.totalorder %s3765_s16, %s3758_s28 }
  0x5c   : > { %p3761_p6 = pnand %p3759_p2, %p4005_p13 }
  0x5d   : > { %p3768_p4 = por %p3767_p3, %p3766_p10 }
  0x5e   : > { %p3762_p5 = pneg %p3761_p6 }
  0x60   : > { %p3769_p7 = pnand %p3768_p4, %p3762_p5 }
  0x62   : > { %3772 = shalt.err (!%p3769_p7)
}
  0x63   : > { %3557 = dma.hbm_to_vmem [thread:$0]  (!%p3999_p12), %s4861_s14, 16, %s480_s27, [#allocation12]  }
  0x64   : > { %p4888_p8 = scmp.ne.s32.totalorder %s4885_s30, 0 }
  0x65   : > { %p4889_p11 = scmp.eq.s32.totalorder (!%p4888_p8), %s3963_s22, 0 }
  0x66   : > { %500 = sbr.rel (%p4888_p8) target bundleno = 2028 (0x7ec), region = 80 }
  0x6b   : > { %3816 = dma.done.wait (%p4889_p11), [#allocation3], 32   ;;  %p4890_p13 = pmov %p4889_p11 }
  0x6c   : > { %p4891_p0 = pmov %p4889_p11 }
  0x6d   : > { %3818 = vsyncadd (%p4890_p13), [#allocation3], 4294967264 }
  0x6e   : > { %3820 = dma.done.wait (%p4891_p0), [#allocation6], 7680   ;;  %p4892_p1 = pmov %p4891_p0 }
  0x6f   : > { %p4893_p9 = pmov %p4891_p0 }
  0x70   : > { %3822 = vsyncadd (%p4892_p1), [#allocation6], 4294959616 }
  0x71   : > { %3824 = dma.done.wait (%p4893_p9), [#allocation9], 32   ;;  %p4894_p12 = pmov %p4891_p0 }
  0x72   : > { %p4895_p2 = pmov %p4891_p0 }
  0x73   : > { %3826 = vsyncadd (%p4894_p12), [#allocation9], 4294967264 }
  0x74   : > { %3828 = dma.done.wait (%p4895_p2), [#allocation12], 16   ;;  %p4896_p6 = pmov %p4891_p0 }
  0x75   : > { %p567_p5 = scmp.lt.s32.totalorder %s3963_s22, 1  ;;  %v3859_v0 = vmov 0.0   ;;  %vm612_vm0 = vcmask 1043456   ;;  %v2961_v1 = vld [vmem:[%s4848_s1 + $0x78] sm:$0xf]  ;;  %v2959_v3 = vld [vmem:[%s4848_s1 + $0x68] sm:$0xff] }
  0x76   : > { %3830 = vsyncadd (%p4896_p6), [#allocation12], 4294967280  ;;  %683 = vmatprep.mubr.f32.mxu0 %v3859_v0  ;;  %784 = vmatprep.mubr.f32.mxu1 %v3859_v0  ;;  %v2960_v2 = vld [vmem:[%s4848_s1 + $0x70] sm:$0xf]  ;;  %v2958_v4 = vld [vmem:[%s4848_s1 + $0x60] sm:$0xff]  ;;  %vm597_vm1 = vcmask 1046528  }
  0x77   : > { %s568_s24 = scalar_select %p567_p5, %s3963_s22, 1  ;;  %2962 = vmatprep.subr.msk.mxu0 %vm612_vm0, %v2961_v1  ;;  %v583_v5 = vld [vmem:[%s4848_s1 + $0x38] sm:$0xf]  ;;  %v2956_v7 = vld [vmem:[%s4848_s1 + $0x50] sm:$0xff]  ;;  %v2955_v9 = vld [vmem:[%s4848_s1 + $0x48] sm:$0xff]  ;;  %vm605_vm2 = vcmask 228352  }
  0x78   : > { %2963 = vmatpush1.msk.msra.mxu0 %vm612_vm0, %v2960_v2  ;;  %v2957_v6 = vld [vmem:[%s4848_s1 + $0x58] sm:$0xff]  ;;  %3505 = vmatprep.subr.msk.mxu1 %vm612_vm0, %v583_v5  ;;  %v582_v8 = vld [vmem:[%s4848_s1 + $0x30] sm:$0xf]  ;;  %v581_v10 = vld [vmem:[%s4848_s1 + $0x28] sm:$0xff]  ;;  %vm924_vm3 = vcmask 1044480   ;;  %vm806_vm4 = vcmask 1045504  }
  0x79   : > { %s3090_s30 = sshll.u32 %s568_s24, 5  ;;  %645 = vmatprep.subr.mxu0 %v2959_v3  ;;  %3509 = vmatpush1.msk.msra.mxu1 %vm612_vm0, %v582_v8  ;;  %v580_v11 = vld [vmem:[%s4848_s1 + $0x20] sm:$0xff]  ;;  %v579_v14 = vld [vmem:[%s4848_s1 + $0x18] sm:$0xff]  ;;  %v578_v18 = vld [vmem:[%s4848_s1 + $0x10] sm:$0xff]  ;;  %vm1176_vm5 = vcmask 195584   ;;  %vm1368_vm6 = vcmask 130048  }
  0x7a   : > { %s4098_s24 = scalar_lea.vmem %s4847_s0, %s3090_s30  ;;  %646 = vmatpush1.msra.mxu0 %v2958_v4  ;;  %3506 = vmatprep.subr.mxu1 %v581_v10  ;;  %v2954_v15 = vld [vmem:[%s4848_s1 + $0x40] sm:$0xff]  ;;  %v577_v19 = vld [vmem:[%s4848_s1 + $0x8] sm:$0xff]  ;;  %v2992_v27 = vld [vmem:[%s4848_s1 + $0xf8] sm:$0xf]  ;;  %vm3860_vm7 = vmmov 0   ;;  %vm1570_vm8 = vcmask 588800  }
  0x7b   : > { %v4122_v12 = vld [vmem:[%s4098_s24] sm:$0xff]  ;;  %v4125_v13 = vld [vmem:[%s4098_s24 + $0x8] sm:$0xff]  ;;  %647 = vmatprep.subr.mxu0 %v2957_v6  ;;  %3510 = vmatpush1.msra.mxu1 %v580_v11  ;;  %v4142_v20 = vld [vmem:[%s4098_s24 + $0x10] sm:$0xff]  ;;  %vm1983_vm9 = vcmask 64512   ;;  %vm2145_vm10 = vcmask 785408   ;;  %vm2310_vm11 = vcmask 392192  }
  0x7c   : > { %v598_v16 = vrot.slane %v4122_v12, 1  ;;  %v599_v17 = vrot.slane %v4125_v13, 1  ;;  %648 = vmatpush1.msra.mxu0 %v2956_v7  ;;  %3507 = vmatprep.subr.mxu1 %v579_v14  ;;  %v576_v22 = vld [vmem:[%s4848_s1] sm:$0xff]  ;;  %v601_v23 = vrot.slane %v4142_v20, 1  ;;  %v4150_v24 = vld [vmem:[%s4098_s24 + $0x18] sm:$0xf] }
  0x7d   : > { %649 = vmatprep.subr.mxu0 %v2955_v9  ;;  %3511 = vmatpush1.msra.mxu1 %v578_v18  ;;  %v603_v26 = vrot.slane %v4150_v24, 1  ;;  %v2991_v28 = vld [vmem:[%s4848_s1 + $0xf0] sm:$0xf]  ;;  %v2979_v30 = vld [vmem:[%s4848_s1 + $0xb8] sm:$0xf]  ;;  %v2990_v31 = vld [vmem:[%s4848_s1 + $0xe8] sm:$0xff] }
  0x7e   : > { %v600_v21 = vsel %vm597_vm1, %v598_v16, %v599_v17  ;;  %650 = vmatpush1.msra.mxu0 %v2954_v15  ;;  %3508 = vmatprep.subr.mxu1 %v577_v19  ;;  %v602_v25 = vsel %vm597_vm1, %v599_v17, %v601_v23  ;;  %v2989_v32 = vld [vmem:[%s4848_s1 + $0xe0] sm:$0xff]  ;;  %v2988_v33 = vld [vmem:[%s4848_s1 + $0xd8] sm:$0xff]  ;;  %v2978_v34 = vld [vmem:[%s4848_s1 + $0xb0] sm:$0xf]  ;;  %v925_v35 = vrot.slane %v4122_v12, 3  ;;  %v926_v36 = vrot.slane %v4125_v13, 3 }
  0x7f   : > { %2964 = vmatmul.mubr.msk.f32.vlgmr.msra.gmra.mxu0 %vm605_vm2, %v600_v21  ;;  %2967 = vmatprep.subr.msk.mxu0 %vm612_vm0, %v583_v5  ;;  %v604_v29 = vsel %vm597_vm1, %v601_v23, %v603_v26  ;;  %v2977_v37 = vld [vmem:[%s4848_s1 + $0xa8] sm:$0xff]  ;;  %v2987_v38 = vld [vmem:[%s4848_s1 + $0xd0] sm:$0xff]  ;;  %v2976_v39 = vld [vmem:[%s4848_s1 + $0xa0] sm:$0xff]  ;;  %v807_v42 = vrot.slane %v4122_v12, 2  ;;  %v808_v43 = vrot.slane %v4125_v13, 2  ;;  %v928_v48 = vrot.slane %v4142_v20, 3 }
  0x80   : > { %689 = vmatprep.mubr.f32.mxu0 %v3859_v0  ;;  %3512 = vmatpush1.msra.mxu1 %v576_v22  ;;  %v2986_v40 = vld [vmem:[%s4848_s1 + $0xc8] sm:$0xff]  ;;  %v2975_v41 = vld [vmem:[%s4848_s1 + $0x98] sm:$0xff]  ;;  %v2985_v44 = vld [vmem:[%s4848_s1 + $0xc0] sm:$0xff]  ;;  %v927_v46 = vsel %vm924_vm3, %v925_v35, %v926_v36  ;;  %v810_v51 = vrot.slane %v4142_v20, 2  ;;  %v930_v56 = vrot.slane %v4150_v24, 3  ;;  %v812_v59 = vrot.slane %v4150_v24, 2 }
  0x81   : > { %2968 = vmatpush1.msk.msra.mxu0 %vm612_vm0, %v582_v8  ;;  %2970 = vmatmul.mubr.msk.f32.vlgmr.msra.gmra.mxu1 %vm605_vm2, %v4125_v13  ;;  %v2974_v45 = vld [vmem:[%s4848_s1 + $0x90] sm:$0xff]  ;;  %v2973_v47 = vld [vmem:[%s4848_s1 + $0x88] sm:$0xff]  ;;  %v2972_v49 = vld [vmem:[%s4848_s1 + $0x80] sm:$0xff]  ;;  %v809_v50 = vsel %vm806_vm4, %v807_v42, %v808_v43  ;;  %v929_v54 = vsel %vm924_vm3, %v926_v36, %v928_v48  ;;  %v1042_v3 = vrot.slane %v4122_v12, 4  ;;  %v1043_v4 = vrot.slane %v4125_v13, 4  ;;  %s4897_s29 = sld [smem:[#allocation24_spill]] }
  0x82   : > { %740 = vmatprep.subr.mxu0 %v581_v10  ;;  %790 = vmatprep.mubr.f32.mxu1 %v3859_v0  ;;  %v3005_v52 = vld [vmem:[%s4848_s1 + $0x138] sm:$0xf]  ;;  %v3004_v53 = vld [vmem:[%s4848_s1 + $0x130] sm:$0xf]  ;;  %v3003_v55 = vld [vmem:[%s4848_s1 + $0x128] sm:$0xff]  ;;  %v811_v58 = vsel %vm806_vm4, %v808_v43, %v810_v51  ;;  %v931_v62 = vsel %vm924_vm3, %v928_v48, %v930_v56  ;;  %v813_v2 = vsel %vm806_vm4, %v810_v51, %v812_v59  ;;  %v1045_v6 = vrot.slane %v4142_v20, 4 }
  0x83   : > { %2965 = vmatmul.mubr.msk.f32.gmra.mxu0 %vm605_vm2, %v602_v25  ;;  %2993 = vmatprep.subr.msk.mxu1 %vm612_vm0, %v2992_v27  ;;  %v3002_v57 = vld [vmem:[%s4848_s1 + $0x120] sm:$0xff]  ;;  %v3001_v60 = vld [vmem:[%s4848_s1 + $0x118] sm:$0xff]  ;;  %v3000_v61 = vld [vmem:[%s4848_s1 + $0x110] sm:$0xff]  ;;  %v1044_v5 = vsel %vm612_vm0, %v1042_v3, %v1043_v4  ;;  %v1047_v8 = vrot.slane %v4150_v24, 4  ;;  %v1152_v43 = vlaneseq  ;;  %vm2645_vm12 = vcmask 982016   ;;  %s565_s15 = sand.u32 1, %s3841_s19  }
  0x84   : > { %741 = vmatpush1.msra.mxu0 %v580_v11  ;;  %695 = vmatprep.mubr.f32.mxu0 %v3859_v0  ;;  %v2999_v63 = vld [vmem:[%s4848_s1 + $0x108] sm:$0xff]  ;;  %v2998_v1 = vld [vmem:[%s4848_s1 + $0x100] sm:$0xff]  ;;  %v1046_v7 = vsel %vm612_vm0, %v1043_v4, %v1045_v6  ;;  %v1364_v11 = vld [vmem:[#allocation5 + $0x70] sm:$0xff]  ;;  %vm2729_vm13 = vcmask 490496   ;;  %s3087_s17 = sshll.u32 %s3963_s22, 4  ;;  %s566_s30 = scalar_lea.vmem [#allocation13], %s565_s15 }
  0x85   : > { %742 = vmatprep.subr.mxu0 %v579_v14  ;;  %2971 = vmatmul.mubr.msk.f32.gmra.mxu1 %vm605_vm2, %v4142_v20  ;;  %v1048_v9 = vsel %vm612_vm0, %v1045_v6, %v1047_v8  ;;  %v1365_v10 = vld [vmem:[#allocation5 + $0x78] sm:$0xff]  ;;  %v1362_v13 = vld [vmem:[#allocation5 + $0x60] sm:$0xff]  ;;  %v1360_v15 = vld [vmem:[#allocation5 + $0x50] sm:$0xff]  ;;  %s2821_s25 = sshll.u32 %s566_s30, 4  ;;  %vm2806_vm14 = vcmask 73728   ;;  %s4898_s16 = sld [smem:[#allocation26_spill]]  ;;  %s2822_s25 = int_to_ptr.vmem [resolvable:$true] %s2821_s25 }
  0x86   : > { %743 = vmatpush1.msra.mxu0 %v578_v18  ;;  %2994 = vmatpush1.msk.msra.mxu1 %vm612_vm0, %v2991_v28  ;;  %v1361_v14 = vld [vmem:[#allocation5 + $0x58] sm:$0xff]  ;;  %v1359_v16 = vld [vmem:[#allocation5 + $0x48] sm:$0xff]  ;;  %v1358_v17 = vld [vmem:[#allocation5 + $0x40] sm:$0xff]  ;;  %s2809_s20 = scalar_lea.sflag [#allocation4], %s565_s15  ;;  %s3773_s18 = scalar_lea.vmem %s2822_s25, 16 }
  0x87   : > { %2966 = vmatmul.mubr.msk.f32.gmra.mxu0 %vm605_vm2, %v604_v29  ;;  %744 = vmatprep.subr.mxu0 %v577_v19  ;;  %v1357_v18 = vld [vmem:[#allocation5 + $0x38] sm:$0xff]  ;;  %v1356_v19 = vld [vmem:[#allocation5 + $0x30] sm:$0xff]  ;;  %v1355_v20 = vld [vmem:[#allocation5 + $0x28] sm:$0xff]  ;;  %p3774_p10 = scmp.ne.s32.totalorder %s2822_s25, %s3773_s18  ;;  %p4899_p3 = scmp.ne.s32.totalorder %s4897_s29, 0 }
  0x88   : > { %745 = vmatpush1.msra.mxu0 %v576_v22  ;;  %778 = vmatprep.mubr.f32.mxu0 %v3859_v0  ;;  %v1150_v3 = vld [vmem:[#allocation2] sm:$0x3]  ;;  %s3861_s22 = smov [#allocation13]  }
  0x89   : > { %2980 = vmatprep.subr.msk.mxu0 %vm612_vm0, %v2979_v30  ;;  %970 = vmatprep.subr.mxu1 %v2990_v31  ;;  %p3775_p4 = pnand %p3774_p10, %p4899_p3  ;;  %s3777_s23 = sshll.u32 %s3861_s22, 4  ;;  %s3778_s23 = int_to_ptr.vmem [resolvable:$false] %s3777_s23 }
  0x8a   : > { %971 = vmatpush1.msra.mxu1 %v2989_v32  ;;  %1008 = vmatprep.mubr.f32.mxu1 %v3859_v0  ;;  %s3779_s26 = scalar_lea.vmem %s3778_s23, 32  ;;  %p3780_p8 = scmp.lt.s32.totalorder %s2822_s25, %s3778_s23 }
  0x8b   : > { %2969 = vmatmul.mubr.msk.f32.vlgmr.msra.gmra.mxu0 %vm605_vm2, %v4122_v12  ;;  %972 = vmatprep.subr.mxu1 %v2988_v33  ;;  %v1363_v12 = vld [vmem:[#allocation5 + $0x68] sm:$0xff]  ;;  %s4812_s24 = scalar_lea.hbm %s4898_s16, %s3087_s17  ;;  %p3776_p7 = pneg %p3775_p4 }
  0x8c   : > { %2981 = vmatpush1.msk.msra.mxu0 %vm612_vm0, %v2978_v34  ;;  %890 = vmatprep.mubr.f32.mxu0 %v3859_v0  ;;  %p3781_p11 = scmp.lt.s32.totalorder %s3779_s26, %s3773_s18 }
  0x8d   : > { %852 = vmatprep.subr.mxu0 %v2977_v37  ;;  %973 = vmatpush1.msra.mxu1 %v2987_v38 }
  0x8e   : > { %853 = vmatpush1.msra.mxu0 %v2976_v39  ;;  %974 = vmatprep.subr.mxu1 %v2986_v40  ;;  %p3782_p13 = por %p3781_p11, %p3780_p8 }
  0x8f   : > { %854 = vmatprep.subr.mxu0 %v2975_v41  ;;  %975 = vmatpush1.msra.mxu1 %v2985_v44 }
  0x90   : > { %855 = vmatpush1.msra.mxu0 %v2974_v45  ;;  %2995 = vmatmul.mubr.msk.f32.vlgmr.msra.gmra.mxu1 %vm605_vm2, %v927_v46  ;;  %p3783_p0 = pnand %p3782_p13, %p3776_p7 }
  0x91   : > { %856 = vmatprep.subr.mxu0 %v2973_v47  ;;  %1014 = vmatprep.mubr.f32.mxu1 %v3859_v0 }
  0x92   : > { %857 = vmatpush1.msra.mxu0 %v2972_v49  ;;  %v1153_v49 = vshrl.u32 %v1152_v43, 7  ;;  %v1458_v43 = vld [vmem:[#allocation5 + $0xc8] sm:$0xff] }
  0x93   : > { %2982 = vmatmul.mubr.msk.f32.vlgmr.msra.gmra.mxu0 %vm605_vm2, %v809_v50  ;;  %3006 = vmatprep.subr.msk.mxu0 %vm612_vm0, %v3005_v52 }
  0x94   : > { %896 = vmatprep.mubr.f32.mxu0 %v3859_v0  ;;  %3007 = vmatpush1.msk.msra.mxu0 %vm612_vm0, %v3004_v53  ;;  %v1158_v4 = vsub.s32 1, %v1153_v49 }
  0x95   : > { %2996 = vmatmul.mubr.msk.f32.gmra.mxu1 %vm605_vm2, %v929_v54  ;;  %1087 = vmatprep.subr.mxu0 %v3003_v55 }
  0x96   : > { %1088 = vmatpush1.msra.mxu0 %v3002_v57  ;;  %1020 = vmatprep.mubr.f32.mxu1 %v3859_v0 }
  0x97   : > { %2983 = vmatmul.mubr.msk.f32.gmra.mxu0 %vm605_vm2, %v811_v58  ;;  %1089 = vmatprep.subr.mxu0 %v3001_v60 }
  0x98   : > { %902 = vmatprep.mubr.f32.mxu0 %v3859_v0  ;;  %1090 = vmatpush1.msra.mxu0 %v3000_v61 }
  0x99   : > { %2997 = vmatmul.mubr.msk.f32.gmra.mxu1 %vm605_vm2, %v931_v62  ;;  %1091 = vmatprep.subr.mxu0 %v2999_v63  ;;  %v1154_v62 = vsub.s32 0, %v1153_v49  ;;  %v1454_v49 = vld [vmem:[#allocation5 + $0xa8] sm:$0xff] }
  0x9a   : > { %1092 = vmatpush1.msra.mxu0 %v2998_v1  ;;  %1247 = vmatprep.mubr.f32.mxu1 %v3859_v0 }
  0x9b   : > { %2984 = vmatmul.mubr.msk.f32.gmra.mxu0 %vm605_vm2, %v813_v2  ;;  %1375 = vmatprep.subr.mxu0 %v3859_v0 }
  0x9c   : > { %1125 = vmatprep.mubr.f32.mxu0 %v3859_v0 }
  0x9f   : > { %3008 = vmatmul.mubr.msk.f32.vlgmr.msra.gmra.mxu0 %vm605_vm2, %v1044_v5 }
  0xa0   : > { %1131 = vmatprep.mubr.f32.mxu0 %v3859_v0  ;;  %1376 = vmatpush1.msra.mxu0 %v1365_v10 }
  0xa1   : > { %1377 = vmatprep.subr.mxu0 %v3859_v0 }
  0xa2   : > { %1378 = vmatpush1.msra.mxu0 %v1364_v11 }
  0xa3   : > { %3009 = vmatmul.mubr.msk.f32.gmra.mxu0 %vm605_vm2, %v1046_v7  ;;  %1379 = vmatprep.subr.mxu0 %v3859_v0 }
  0xa4   : > { %1137 = vmatprep.mubr.f32.mxu0 %v3859_v0  ;;  %1380 = vmatpush1.msra.mxu0 %v1363_v12  ;;  %v1155_v12 = vrot.slane %v1150_v3, %v1154_v62 }
  0xa5   : > { %1381 = vmatprep.subr.mxu0 %v3859_v0 }
  0xa6   : > { %1382 = vmatpush1.msra.mxu0 %v1362_v13 }
  0xa7   : > { %3010 = vmatmul.mubr.msk.f32.gmra.mxu0 %vm605_vm2, %v1048_v9  ;;  %1383 = vmatprep.subr.mxu0 %v3859_v0 }
  0xa8   : > { %1384 = vmatpush1.msra.mxu0 %v1361_v14 }
  0xa9   : > { %1385 = vmatprep.subr.mxu0 %v3859_v0 }
  0xaa   : > { %1386 = vmatpush1.msra.mxu0 %v1360_v15 }
  0xab   : > { %1387 = vmatprep.subr.mxu0 %v3859_v0 }
  0xac   : > { %1388 = vmatpush1.msra.mxu0 %v1359_v16  ;;  %v1159_v16 = vrot.slane %v1150_v3, %v1158_v4 }
  0xad   : > { %1389 = vmatprep.subr.mxu0 %v3859_v0 }
  0xae   : > { %1390 = vmatpush1.msra.mxu0 %v1358_v17 }
  0xaf   : > { %1391 = vmatprep.subr.mxu0 %v3859_v0 }
  0xb0   : > { %1392 = vmatpush1.msra.mxu0 %v1357_v18 }
  0xb1   : > { %1393 = vmatprep.subr.mxu0 %v3859_v0 }
  0xb2   : > { %1394 = vmatpush1.msra.mxu0 %v1356_v19 }
  0xb3   : > { %1395 = vmatprep.subr.mxu0 %v3859_v0 }
  0xb4   : > { %1396 = vmatpush1.msra.mxu0 %v1355_v20 }
  0xb5   : > { %1397 = vmatprep.subr.mxu0 %v3859_v0 }
 0x13f   : > { %v685_v21 = vpop.f32.mrf.mxu0 }
 0x141   : > { %v687_v22 = vpop.f32.mrf.mxu0  ;;  %v786_v24 = vpop.f32.mrf.mxu1 }
 0x143   : > { %v691_v23 = vpop.f32.mrf.mxu0  ;;  %v788_v26 = vpop.f32.mrf.mxu1 }
 0x144   : > { %v787_v47 = vadd.f32 %v786_v24, %v691_v23 }
 0x145   : > { %v693_v25 = vpop.f32.mrf.mxu0  ;;  %v792_v29 = vpop.f32.mrf.mxu1 }
 0x146   : > { %v789_v45 = vadd.f32 %v788_v26, %v693_v25 }
 0x147   : > { %v697_v27 = vpop.f32.mrf.mxu0  ;;  %v794_v31 = vpop.f32.mrf.mxu1 }
 0x148   : > { %v793_v46 = vadd.f32 %v792_v29, %v697_v27 }
 0x149   : > { %v699_v28 = vpop.f32.mrf.mxu0 }
 0x14a   : > { %v795_v51 = vadd.f32 %v794_v31, %v699_v28  ;;  %v1174_v31 = vld [vmem:[%s4850_s3] sm:$0xff] }
 0x14b   : > { %v780_v30 = vpop.f32.mrf.mxu0 }
 0x14c   : > { %v781_v55 = vadd.f32 %v780_v30, %v685_v21 }
 0x14d   : > { %v782_v32 = vpop.f32.mrf.mxu0 }
 0x14e   : > { %v783_v52 = vadd.f32 %v782_v32, %v687_v22  ;;  %v1175_v32 = vld [vmem:[%s4850_s3 + $0x8] sm:$0xf] }
 0x150   : > { %v1010_v33 = vpop.f32.mrf.mxu1 }
 0x152   : > { %v1012_v36 = vpop.f32.mrf.mxu1 }
 0x153   : > { %v892_v34 = vpop.f32.mrf.mxu0 }
 0x154   : > { %v909_v60 = vadd.f32 %v892_v34, %v781_v55  ;;  %v1466_v34 = vld [vmem:[#allocation5 + $0x108] sm:$0xff]  ;;  %v1451_v55 = vld [vmem:[#allocation5 + $0x90] sm:$0xff] }
 0x155   : > { %v894_v35 = vpop.f32.mrf.mxu0  ;;  %v1016_v39 = vpop.f32.mrf.mxu1 }
 0x156   : > { %v910_v58 = vadd.f32 %v894_v35, %v783_v52  ;;  %v1027_v11 = vadd.f32 %v1010_v33, %v909_v60  ;;  %v3013_v33 = vld [vmem:[%s4850_s3 + $0x10] sm:$0xff]  ;;  %v1465_v35 = vld [vmem:[#allocation5 + $0x100] sm:$0xff] }
 0x157   : > { %v898_v37 = vpop.f32.mrf.mxu0  ;;  %v1018_v41 = vpop.f32.mrf.mxu1  ;;  %v1351_v52 = vld [vmem:[#allocation5 + $0x8] sm:$0xff] }
 0x158   : > { %v911_v56 = vadd.f32 %v898_v37, %v787_v47  ;;  %v1028_v7 = vadd.f32 %v1012_v36, %v910_v58  ;;  %v3014_v36 = vld [vmem:[%s4850_s3 + $0x18] sm:$0xf]  ;;  %v1366_v58 = vld [vmem:[#allocation5 + $0x80] sm:$0xff] }
 0x159   : > { %v900_v38 = vpop.f32.mrf.mxu0  ;;  %v1022_v48 = vpop.f32.mrf.mxu1  ;;  %v1464_v37 = vld [vmem:[#allocation5 + $0xf8] sm:$0xff]  ;;  %v1455_v47 = vld [vmem:[#allocation5 + $0xb0] sm:$0xff] }
 0x15a   : > { %v912_v53 = vadd.f32 %v900_v38, %v789_v45  ;;  %v1029_v5 = vadd.f32 %v1016_v39, %v911_v56  ;;  %v1463_v38 = vld [vmem:[#allocation5 + $0xf0] sm:$0xff]  ;;  %v1462_v39 = vld [vmem:[#allocation5 + $0xe8] sm:$0xff]  ;;  %v1456_v45 = vld [vmem:[#allocation5 + $0xb8] sm:$0xff] }
 0x15b   : > { %v904_v40 = vpop.f32.mrf.mxu0  ;;  %v1024_v61 = vpop.f32.mrf.mxu1  ;;  %v1367_v56 = vld [vmem:[#allocation5 + $0x88] sm:$0xff] }
 0x15c   : > { %v913_v54 = vadd.f32 %v904_v40, %v793_v46  ;;  %v1030_v1 = vadd.f32 %v1018_v41, %v912_v53  ;;  %v1461_v40 = vld [vmem:[#allocation5 + $0xe0] sm:$0xff]  ;;  %v1460_v41 = vld [vmem:[#allocation5 + $0xd8] sm:$0xff] }
 0x15d   : > { %v906_v42 = vpop.f32.mrf.mxu0  ;;  %v1354_v46 = vld [vmem:[#allocation5 + $0x20] sm:$0xff]  ;;  %v1452_v53 = vld [vmem:[#allocation5 + $0x98] sm:$0xff] }
 0x15e   : > { %v914_v59 = vadd.f32 %v906_v42, %v795_v51  ;;  %v1031_v2 = vadd.f32 %v1022_v48, %v913_v54  ;;  %v1459_v42 = vld [vmem:[#allocation5 + $0xd0] sm:$0xff]  ;;  %1398 = vmatpush1.msra.mxu0 %v1354_v46  ;;  %v1353_v48 = vld [vmem:[#allocation5 + $0x18] sm:$0xff]  ;;  %v1453_v51 = vld [vmem:[#allocation5 + $0xa0] sm:$0xff] }
 0x15f   : > { %v1127_v44 = vpop.f32.mrf.mxu0  ;;  %1399 = vmatprep.subr.mxu0 %v3859_v0  ;;  %v1350_v54 = vld [vmem:[#allocation5] sm:$0xff] }
 0x160   : > { %v1032_v8 = vadd.f32 %v1024_v61, %v914_v59  ;;  %v1144_v18 = vadd.f32 %v1127_v44, %v1027_v11  ;;  %v1457_v44 = vld [vmem:[#allocation5 + $0xc0] sm:$0xff]  ;;  %1400 = vmatpush1.msra.mxu0 %v1353_v48  ;;  %v1467_v59 = vld [vmem:[#allocation5 + $0x110] sm:$0xff] }
 0x161   : > { %v1129_v50 = vpop.f32.mrf.mxu0  ;;  %1401 = vmatprep.subr.mxu0 %v3859_v0  ;;  %v1553_v11 = vld [vmem:[%s4852_s5 + $0x38] sm:$0xff]  ;;  %v3039_v46 = vld [vmem:[%s4852_s5 + $0xc8] sm:$0xff]  ;;  %v3038_v48 = vld [vmem:[%s4852_s5 + $0xc0] sm:$0xff] }
 0x162   : > { %v1145_v15 = vadd.f32 %v1129_v50, %v1028_v7  ;;  %v1162_v25 = vadd.f32 %v1155_v12, %v1144_v18  ;;  %v1352_v50 = vld [vmem:[#allocation5 + $0x10] sm:$0xff]  ;;  %v3029_v7 = vld [vmem:[%s4852_s5 + $0x88] sm:$0xff] }
 0x163   : > { %v1133_v57 = vpop.f32.mrf.mxu0  ;;  %1402 = vmatpush1.msra.mxu0 %v1352_v50  ;;  %v1549_v18 = vld [vmem:[%s4852_s5 + $0x18] sm:$0xff] }
 0x164   : > { %v1146_v13 = vadd.f32 %v1133_v57, %v1029_v5  ;;  %v1163_v23 = vadd.f32 %v1159_v16, %v1145_v15  ;;  %v1168_v30 = vmax.f32 %v1162_v25, 0.0  ;;  %1403 = vmatprep.subr.mxu0 %v3859_v0  ;;  %v1468_v57 = vld [vmem:[#allocation5 + $0x118] sm:$0xff]  ;;  %v1551_v15 = vld [vmem:[%s4852_s5 + $0x28] sm:$0xff]  ;;  %v3022_v25 = vld [vmem:[%s4852_s5 + $0x50] sm:$0xff] }
 0x165   : > { %v1135_v63 = vpop.f32.mrf.mxu0  ;;  %1404 = vmatpush1.msra.mxu0 %v1351_v52  ;;  %v3037_v50 = vld [vmem:[%s4852_s5 + $0xb8] sm:$0xff] }
 0x166   : > { %v1147_v9 = vadd.f32 %v1135_v63, %v1030_v1  ;;  %v1164_v22 = vadd.f32 %v1155_v12, %v1146_v13  ;;  %v1169_v29 = vmax.f32 %v1163_v23, 0.0  ;;  %1405 = vmatprep.subr.mxu0 %v3859_v0  ;;  %v1552_v13 = vld [vmem:[%s4852_s5 + $0x30] sm:$0xff]  ;;  %v3024_v23 = vld [vmem:[%s4852_s5 + $0x60] sm:$0xff] }
 0x167   : > { %v1139_v6 = vpop.f32.mrf.mxu0  ;;  %1406 = vmatpush1.msra.mxu0 %v1350_v54  ;;  %v3042_v54 = vld [vmem:[%s4852_s5 + $0xd8] sm:$0xff] }
 0x168   : > { %v1148_v10 = vadd.f32 %v1139_v6, %v1031_v2  ;;  %v1165_v20 = vadd.f32 %v1159_v16, %v1147_v9  ;;  %v1170_v28 = vmax.f32 %v1164_v22, 0.0  ;;  %1435 = vmatprep.subr.mxu0 %v3859_v0  ;;  %v1554_v6 = vld [vmem:[%s4852_s5 + $0x40] sm:$0xff] }
 0x169   : > { %v1141_v14 = vpop.f32.mrf.mxu0  ;;  %1436 = vmatpush2.msra.mxu0 %v1367_v56  ;;  %v1546_v22 = vld [vmem:[%s4852_s5] sm:$0xff] }
 0x16a   : > { %v1149_v17 = vadd.f32 %v1141_v14, %v1032_v8  ;;  %v1166_v19 = vadd.f32 %v1155_v12, %v1148_v10  ;;  %v1171_v27 = vmax.f32 %v1165_v20, 0.0  ;;  %1437 = vmatprep.subr.mxu0 %v3859_v0  ;;  %v3028_v12 = vld [vmem:[%s4852_s5 + $0x80] sm:$0xff]  ;;  %v3027_v14 = vld [vmem:[%s4852_s5 + $0x78] sm:$0xff]  ;;  %v1547_v20 = vld [vmem:[%s4852_s5 + $0x8] sm:$0xff] }
 0x16b   : > { %1438 = vmatpush2.msra.mxu0 %v1366_v58  ;;  %v3034_v58 = vld [vmem:[%s4852_s5 + $0xa0] sm:$0xff] }
 0x16c   : > { %v1167_v21 = vadd.f32 %v1159_v16, %v1149_v17  ;;  %v1172_v26 = vmax.f32 %v1166_v19, 0.0  ;;  %3224 = vmatprep.subr.mxu0 %v3859_v0  ;;  %v3026_v16 = vld [vmem:[%s4852_s5 + $0x70] sm:$0xff]  ;;  %v1550_v17 = vld [vmem:[%s4852_s5 + $0x20] sm:$0xff] }
 0x16d   : > { %v1548_v19 = vld [vmem:[%s4852_s5 + $0x10] sm:$0xff] }
 0x16e   : > { %v1173_v24 = vmax.f32 %v1167_v21, 0.0  ;;  %v3025_v21 = vld [vmem:[%s4852_s5 + $0x68] sm:$0xff] }
 0x170   : > { %1209 = vmatprep.subr.mxu1 %v1173_v24 }
 0x171   : > { %1210 = vmatpush1.msra.mxu1 %v1172_v26 }
 0x172   : > { %1211 = vmatprep.subr.mxu1 %v1171_v27 }
 0x173   : > { %1212 = vmatpush1.msra.mxu1 %v1170_v28 }
 0x174   : > { %1213 = vmatprep.subr.mxu1 %v1169_v29 }
 0x175   : > { %1214 = vmatpush1.msra.mxu1 %v1168_v30 }
 0x176   : > { %3011 = vmatmul.mubr.msk.f32.vlgmr.msra.gmra.mxu1 %vm1176_vm5, %v1174_v31  ;;  %1295 = vmatprep.subr.mxu1 %v1173_v24  ;;  %v3023_v24 = vld [vmem:[%s4852_s5 + $0x58] sm:$0xff] }
 0x177   : > { %1296 = vmatpush1.msra.mxu1 %v1172_v26  ;;  %1253 = vmatprep.mubr.f32.mxu1 %v3859_v0  ;;  %v3021_v26 = vld [vmem:[%s4852_s5 + $0x48] sm:$0xff] }
 0x178   : > { %1297 = vmatprep.subr.mxu1 %v1171_v27 }
 0x179   : > { %1298 = vmatpush1.msra.mxu1 %v1170_v28 }
 0x17a   : > { %3012 = vmatmul.mubr.msk.f32.gmra.mxu1 %vm1176_vm5, %v1175_v32  ;;  %1299 = vmatprep.subr.mxu1 %v1169_v29 }
 0x17b   : > { %1300 = vmatpush1.msra.mxu1 %v1168_v30  ;;  %1333 = vmatprep.mubr.f32.mxu1 %v3859_v0  ;;  %v3050_v30 = vld [vmem:[%s4852_s5 + $0x118] sm:$0xff] }
 0x17c   : > { %1469 = vmatprep.subr.mxu1 %v3859_v0 }
 0x17e   : > { %3015 = vmatmul.mubr.msk.f32.vlgmr.msra.gmra.mxu1 %vm1176_vm5, %v3013_v33  ;;  %v3049_v33 = vld [vmem:[%s4852_s5 + $0x110] sm:$0xff] }
 0x17f   : > { %1339 = vmatprep.mubr.f32.mxu1 %v3859_v0  ;;  %1470 = vmatpush1.msra.mxu1 %v1466_v34 }
 0x180   : > { %1471 = vmatprep.subr.mxu1 %v3859_v0 }
 0x181   : > { %1472 = vmatpush1.msra.mxu1 %v1465_v35 }
 0x182   : > { %3016 = vmatmul.mubr.msk.f32.gmra.mxu1 %vm1176_vm5, %v3014_v36  ;;  %1473 = vmatprep.subr.mxu1 %v3859_v0 }
 0x183   : > { %1474 = vmatpush1.msra.mxu1 %v1464_v37  ;;  %v3048_v37 = vld [vmem:[%s4852_s5 + $0x108] sm:$0xff] }
 0x184   : > { %1475 = vmatprep.subr.mxu1 %v3859_v0 }
 0x185   : > { %1476 = vmatpush1.msra.mxu1 %v1463_v38 }
 0x186   : > { %1477 = vmatprep.subr.mxu1 %v3859_v0 }
 0x187   : > { %1478 = vmatpush1.msra.mxu1 %v1462_v39 }
 0x188   : > { %1479 = vmatprep.subr.mxu1 %v3859_v0 }
 0x189   : > { %1480 = vmatpush1.msra.mxu1 %v1461_v40 }
 0x18a   : > { %1481 = vmatprep.subr.mxu1 %v3859_v0 }
 0x18b   : > { %1482 = vmatpush1.msra.mxu1 %v1460_v41  ;;  %v3047_v41 = vld [vmem:[%s4852_s5 + $0x100] sm:$0xff] }
 0x18c   : > { %1483 = vmatprep.subr.mxu1 %v3859_v0 }
 0x18d   : > { %1484 = vmatpush1.msra.mxu1 %v1459_v42 }
 0x18e   : > { %1485 = vmatprep.subr.mxu1 %v3859_v0 }
 0x18f   : > { %1486 = vmatpush1.msra.mxu1 %v1458_v43  ;;  %v3040_v43 = vld [vmem:[%s4852_s5 + $0xd0] sm:$0xff] }
 0x190   : > { %1487 = vmatprep.subr.mxu1 %v3859_v0 }
 0x191   : > { %1488 = vmatpush1.msra.mxu1 %v1457_v44 }
 0x192   : > { %1489 = vmatprep.subr.mxu1 %v3859_v0 }
 0x193   : > { %1490 = vmatpush1.msra.mxu1 %v1456_v45  ;;  %v3046_v45 = vld [vmem:[%s4852_s5 + $0xf8] sm:$0xff] }
 0x194   : > { %1491 = vmatprep.subr.mxu1 %v3859_v0 }
 0x195   : > { %1492 = vmatpush1.msra.mxu1 %v1455_v47  ;;  %v3045_v47 = vld [vmem:[%s4852_s5 + $0xf0] sm:$0xff] }
 0x196   : > { %1493 = vmatprep.subr.mxu1 %v3859_v0 }
 0x197   : > { %1494 = vmatpush1.msra.mxu1 %v1454_v49  ;;  %v3044_v49 = vld [vmem:[%s4852_s5 + $0xe8] sm:$0xff] }
 0x198   : > { %1495 = vmatprep.subr.mxu1 %v3859_v0 }
 0x199   : > { %1496 = vmatpush1.msra.mxu1 %v1453_v51  ;;  %v3043_v51 = vld [vmem:[%s4852_s5 + $0xe0] sm:$0xff] }
 0x19a   : > { %1497 = vmatprep.subr.mxu1 %v3859_v0 }
 0x19b   : > { %1498 = vmatpush1.msra.mxu1 %v1452_v53  ;;  %v3036_v53 = vld [vmem:[%s4852_s5 + $0xb0] sm:$0xff] }
 0x19c   : > { %1499 = vmatprep.subr.mxu1 %v3859_v0 }
 0x19d   : > { %1500 = vmatpush1.msra.mxu1 %v1451_v55  ;;  %v3035_v55 = vld [vmem:[%s4852_s5 + $0xa8] sm:$0xff] }
 0x19e   : > { %1529 = vmatprep.subr.mxu1 %v3859_v0 }
 0x19f   : > { %1530 = vmatpush2.msra.mxu1 %v1468_v57 }
 0x1a0   : > { %1531 = vmatprep.subr.mxu1 %v3859_v0 }
 0x1a1   : > { %1532 = vmatpush2.msra.mxu1 %v1467_v59  ;;  %v3033_v59 = vld [vmem:[%s4852_s5 + $0x98] sm:$0xff] }
 0x1a2   : > { %3245 = vmatprep.subr.mxu1 %v3859_v0 }
 0x236   : > { %v1249_v60 = vpop.f32.mrf.mxu1 }
 0x238   : > { %v1251_v61 = vpop.f32.mrf.mxu1 }
 0x23a   : > { %v1255_v62 = vpop.f32.mrf.mxu1 }
 0x23c   : > { %v1257_v63 = vpop.f32.mrf.mxu1 }
 0x23e   : > { %v1335_v1 = vpop.f32.mrf.mxu1 }
 0x23f   : > { %v1346_v4 = vmax.f32 %v1249_v60, %v1335_v1 }
 0x240   : > { %v1337_v2 = vpop.f32.mrf.mxu1 }
 0x241   : > { %v1347_v3 = vmax.f32 %v1251_v61, %v1337_v2  ;;  %v3032_v61 = vld [vmem:[%s4852_s5 + $0x90] sm:$0xff]  ;;  %v3059_v2 = vld [vmem:[%s4852_s5 + $0x158] sm:$0xff] }
 0x242   : > { %v1341_v5 = vpop.f32.mrf.mxu1 }
 0x243   : > { %3017 = vmatprep.mubr.msk.f32.mxu0 %vm1368_vm6, %v1347_v3  ;;  %3019 = vmatprep.mubr.msk.f32.mxu1 %vm1368_vm6, %v1347_v3  ;;  %v1348_v10 = vmax.f32 %v1255_v62, %v1341_v5  ;;  %v3058_v3 = vld [vmem:[%s4852_s5 + $0x150] sm:$0xff]  ;;  %v3056_v5 = vld [vmem:[%s4852_s5 + $0x140] sm:$0xff] }
 0x244   : > { %v1343_v8 = vpop.f32.mrf.mxu1  ;;  %1440 = vmatmul.mubr.f32.vlgmr.msra.gmra.mxu0 %v1346_v4  ;;  %1534 = vmatmul.mubr.f32.vlgmr.msra.gmra.mxu1 %v1346_v4  ;;  %v3057_v4 = vld [vmem:[%s4852_s5 + $0x148] sm:$0xff] }
 0x245   : > { %v1349_v9 = vmax.f32 %v1257_v63, %v1343_v8  ;;  %3246 = vmatpush3.msra.mxu1 %v1554_v6  ;;  %3225 = vmatpush3.msra.mxu0 %v3029_v7  ;;  %v3060_v63 = vld [vmem:[%s4852_s5 + $0x160] sm:$0xff]  ;;  %v3055_v6 = vld [vmem:[%s4852_s5 + $0x138] sm:$0xff]  ;;  %v3054_v7 = vld [vmem:[%s4852_s5 + $0x130] sm:$0xff] }
 0x246   : > { %3247 = vmatprep.subr.mxu1 %v3859_v0  ;;  %3226 = vmatprep.subr.mxu0 %v3859_v0  ;;  %v3053_v8 = vld [vmem:[%s4852_s5 + $0x128] sm:$0xff] }
 0x247   : > { %3018 = vmatprep.mubr.msk.f32.mxu0 %vm1368_vm6, %v1349_v9  ;;  %3020 = vmatprep.mubr.msk.f32.mxu1 %vm1368_vm6, %v1349_v9 }
 0x248   : > { %1445 = vmatmul.mubr.f32.gmra.mxu0 %v1348_v10  ;;  %1539 = vmatmul.mubr.f32.gmra.mxu1 %v1348_v10  ;;  %v3052_v10 = vld [vmem:[%s4852_s5 + $0x120] sm:$0xff] }
 0x249   : > { %3248 = vmatpush3.msra.mxu1 %v1553_v11  ;;  %3227 = vmatpush3.msra.mxu0 %v3028_v12 }
 0x24a   : > { %3249 = vmatprep.subr.mxu1 %v3859_v0  ;;  %3228 = vmatprep.subr.mxu0 %v3859_v0 }
 0x24b   : > { %3250 = vmatpush3.msra.mxu1 %v1552_v13  ;;  %3229 = vmatpush3.msra.mxu0 %v3027_v14  ;;  %v3078_v13 = vld [vmem:[%s4855_s8 + $0xb8] sm:$0xff]  ;;  %v3077_v14 = vld [vmem:[%s4855_s8 + $0xb0] sm:$0xff] }
 0x24c   : > { %3251 = vmatprep.subr.mxu1 %v3859_v0  ;;  %3230 = vmatprep.subr.mxu0 %v3859_v0 }
 0x24d   : > { %3252 = vmatpush3.msra.mxu1 %v1551_v15  ;;  %3231 = vmatpush3.msra.mxu0 %v3026_v16  ;;  %v3076_v15 = vld [vmem:[%s4855_s8 + $0xa8] sm:$0xff]  ;;  %v3075_v16 = vld [vmem:[%s4855_s8 + $0xa0] sm:$0xff] }
 0x24e   : > { %3253 = vmatprep.subr.mxu1 %v3859_v0  ;;  %3232 = vmatprep.subr.mxu0 %v3859_v0 }
 0x24f   : > { %3254 = vmatpush3.msra.mxu1 %v1550_v17  ;;  %3233 = vmatpush3.msra.mxu0 %v3025_v21  ;;  %v3074_v17 = vld [vmem:[%s4855_s8 + $0x98] sm:$0xff] }
 0x250   : > { %3255 = vmatprep.subr.mxu1 %v3859_v0  ;;  %3234 = vmatprep.subr.mxu0 %v3859_v0 }
 0x251   : > { %3256 = vmatpush3.msra.mxu1 %v1549_v18  ;;  %3235 = vmatpush3.msra.mxu0 %v3024_v23  ;;  %v3073_v18 = vld [vmem:[%s4855_s8 + $0x90] sm:$0xff] }
 0x252   : > { %3257 = vmatprep.subr.mxu1 %v3859_v0  ;;  %3263 = vmatprep.mubr.msk.f32.mxu1 %vm3860_vm7, %v3859_v0 }
 0x253   : > { %3258 = vmatpush3.msra.mxu1 %v1548_v19  ;;  %3236 = vmatprep.subr.mxu0 %v3859_v0  ;;  %v3072_v19 = vld [vmem:[%s4855_s8 + $0x88] sm:$0xff] }
 0x254   : > { %3259 = vmatprep.subr.mxu1 %v3859_v0  ;;  %3242 = vmatprep.mubr.msk.f32.mxu0 %vm3860_vm7, %v3859_v0 }
 0x255   : > { %3260 = vmatpush3.msra.mxu1 %v1547_v20  ;;  %3237 = vmatpush3.msra.mxu0 %v3023_v24  ;;  %v3071_v20 = vld [vmem:[%s4855_s8 + $0x80] sm:$0xff] }
 0x256   : > { %3261 = vmatprep.subr.mxu1 %v3859_v0  ;;  %3238 = vmatprep.subr.mxu0 %v3859_v0 }
 0x257   : > { %3262 = vmatpush3.msra.mxu1 %v1546_v22  ;;  %3239 = vmatpush3.msra.mxu0 %v3022_v25 }
 0x258   : > { %3287 = vmatprep.subr.mxu1 %v3859_v0  ;;  %3240 = vmatprep.subr.mxu0 %v3859_v0 }
 0x259   : > { %3241 = vmatpush3.msra.mxu0 %v3021_v26 }
 0x25a   : > { %3266 = vmatprep.subr.mxu0 %v3859_v0 }
 0x304   : > { %v1441_v27 = vpop.f32.mrf.mxu0  ;;  %v1535_v28 = vpop.f32.mrf.mxu1 }
 0x305   : > { %v4425_v29 = vmax.f32 %v1441_v27, %v1535_v28 }
 0x306   : > { %v1443_v31 = vpop.f32.mrf.mxu0  ;;  %v1537_v32 = vpop.f32.mrf.mxu1 }
 0x307   : > { %3264 = vmatmul.mubr.msk.f32.vlgmr.msra.gmra.mxu1 %vm1570_vm8, %v4425_v29  ;;  %v1567_v42 = vrot.slane %v4425_v29, 1  ;;  %v1811_v56 = vrot.slane %v4425_v29, 3  ;;  %v1725_v62 = vrot.slane %v4425_v29, 2  ;;  %v1897_v11 = vrot.slane %v4425_v29, 4 }
 0x308   : > { %3288 = vmatpush3.msra.mxu1 %v3050_v30  ;;  %v1446_v34 = vpop.f32.mrf.mxu0  ;;  %v1540_v35 = vpop.f32.mrf.mxu1  ;;  %3305 = vmatprep.mubr.msk.f32.mxu1 %vm3860_vm7, %v3859_v0 }
 0x309   : > { %v4437_v36 = vmax.f32 %v1446_v34, %v1540_v35  ;;  %3289 = vmatprep.subr.mxu1 %v3859_v0 }
 0x30a   : > { %3290 = vmatpush3.msra.mxu1 %v3049_v33  ;;  %v1448_v38 = vpop.f32.mrf.mxu0  ;;  %v1542_v39 = vpop.f32.mrf.mxu1  ;;  %v3062_v33 = vld [vmem:[%s4853_s6] ss:$0 sm:$0xff] }
 0x30b   : > { %v1568_v40 = vrot.slane %v4437_v36, 1  ;;  %3291 = vmatprep.subr.mxu1 %v3859_v0  ;;  %v1812_v52 = vrot.slane %v4437_v36, 3  ;;  %v1726_v60 = vrot.slane %v4437_v36, 2  ;;  %v1898_v9 = vrot.slane %v4437_v36, 4  ;;  %v1982_v38 = vld [vmem:[%s4854_s7] sm:$0xf] }
 0x30c   : > { %3292 = vmatpush3.msra.mxu1 %v3048_v37  ;;  %v3064_v39 = vld [vmem:[%s4854_s7 + $0x4] sm:$0xf] }
 0x30d   : > { %3293 = vmatprep.subr.mxu1 %v3859_v0  ;;  %v1569_v44 = vsel %vm597_vm1, %v1567_v42, %v1568_v40  ;;  %v1813_v57 = vsel %vm924_vm3, %v1811_v56, %v1812_v52  ;;  %v1727_v1 = vsel %vm806_vm4, %v1725_v62, %v1726_v60  ;;  %v1899_v12 = vsel %vm612_vm0, %v1897_v11, %v1898_v9  ;;  %v2144_v40 = vld [vmem:[%s4855_s8 + $0x58] sm:$0xff]  ;;  %v2142_v42 = vld [vmem:[%s4855_s8 + $0x48] sm:$0xff] }
 0x30e   : > { %3294 = vmatpush3.msra.mxu1 %v3047_v41  ;;  %3243 = vmatmul.mubr.msk.f32.vlgmr.msra.gmra.mxu0 %vm1570_vm8, %v1569_v44  ;;  %v2143_v41 = vld [vmem:[%s4855_s8 + $0x50] sm:$0xff]  ;;  %v2140_v44 = vld [vmem:[%s4855_s8 + $0x38] sm:$0xff]  ;;  %v2134_v52 = vld [vmem:[%s4855_s8 + $0x8] sm:$0xff] }
 0x30f   : > { %3267 = vmatpush3.msra.mxu0 %v3040_v43  ;;  %3295 = vmatprep.subr.mxu1 %v3859_v0  ;;  %v2141_v43 = vld [vmem:[%s4855_s8 + $0x40] sm:$0xff]  ;;  %v2309_v60 = vld [vmem:[#allocation7 + $0x28] sm:$0xff]  ;;  %v2386_v9 = vld [vmem:[#allocation7 + $0x30] sm:$0xff] }
 0x310   : > { %3268 = vmatprep.subr.mxu0 %v3859_v0  ;;  %3296 = vmatpush3.msra.mxu1 %v3046_v45  ;;  %v2139_v45 = vld [vmem:[%s4855_s8 + $0x30] sm:$0xff] }
 0x311   : > { %3269 = vmatpush3.msra.mxu0 %v3039_v46  ;;  %3297 = vmatprep.subr.mxu1 %v3859_v0  ;;  %v2138_v46 = vld [vmem:[%s4855_s8 + $0x28] sm:$0xff] }
 0x312   : > { %3270 = vmatprep.subr.mxu0 %v3859_v0  ;;  %3298 = vmatpush3.msra.mxu1 %v3045_v47  ;;  %v2137_v47 = vld [vmem:[%s4855_s8 + $0x20] sm:$0xff] }
 0x313   : > { %3271 = vmatpush3.msra.mxu0 %v3038_v48  ;;  %3299 = vmatprep.subr.mxu1 %v3859_v0  ;;  %v2136_v48 = vld [vmem:[%s4855_s8 + $0x18] sm:$0xff] }
 0x314   : > { %3272 = vmatprep.subr.mxu0 %v3859_v0  ;;  %3300 = vmatpush3.msra.mxu1 %v3044_v49  ;;  %v3070_v49 = vld [vmem:[%s4855_s8 + $0x78] sm:$0xff] }
 0x315   : > { %3273 = vmatpush3.msra.mxu0 %v3037_v50  ;;  %3301 = vmatprep.subr.mxu1 %v3859_v0  ;;  %v2135_v50 = vld [vmem:[%s4855_s8 + $0x10] sm:$0xff] }
 0x316   : > { %3274 = vmatprep.subr.mxu0 %v3859_v0  ;;  %3302 = vmatpush3.msra.mxu1 %v3043_v51  ;;  %v3069_v51 = vld [vmem:[%s4855_s8 + $0x70] sm:$0xff] }
 0x317   : > { %3275 = vmatpush3.msra.mxu0 %v3036_v53  ;;  %3303 = vmatprep.subr.mxu1 %v3859_v0  ;;  %v3068_v53 = vld [vmem:[%s4855_s8 + $0x68] sm:$0xff] }
 0x318   : > { %3276 = vmatprep.subr.mxu0 %v3859_v0  ;;  %3304 = vmatpush3.msra.mxu1 %v3042_v54  ;;  %v2133_v54 = vld [vmem:[%s4855_s8] sm:$0xff] }
 0x319   : > { %3277 = vmatpush3.msra.mxu0 %v3035_v55  ;;  %3306 = vmatmul.mubr.msk.f32.vlgmr.msra.gmra.mxu1 %vm1570_vm8, %v1813_v57  ;;  %v3067_v55 = vld [vmem:[%s4855_s8 + $0x60] sm:$0xff] }
 0x31a   : > { %3278 = vmatprep.subr.mxu0 %v3859_v0  ;;  %3284 = vmatprep.mubr.msk.f32.mxu0 %vm3860_vm7, %v3859_v0 }
 0x31b   : > { %3279 = vmatpush3.msra.mxu0 %v3034_v58  ;;  %3329 = vmatprep.subr.mxu1 %v3859_v0 }
 0x31c   : > { %3280 = vmatprep.subr.mxu0 %v3859_v0  ;;  %3331 = vmatprep.mubr.msk.f32.mxu1 %vm3860_vm7, %v3859_v0 }
 0x31d   : > { %3281 = vmatpush3.msra.mxu0 %v3033_v59 }
 0x31e   : > { %3282 = vmatprep.subr.mxu0 %v3859_v0 }
 0x31f   : > { %3283 = vmatpush3.msra.mxu0 %v3032_v61  ;;  %v2391_v61 = vld [vmem:[#allocation7 + $0x58] sm:$0xff] }
 0x320   : > { %3285 = vmatmul.mubr.msk.f32.vlgmr.msra.gmra.mxu0 %vm1570_vm8, %v1727_v1  ;;  %3308 = vmatprep.subr.mxu0 %v3859_v0  ;;  %v2390_v1 = vld [vmem:[#allocation7 + $0x50] sm:$0xff] }
 0x321   : > { %3309 = vmatpush3.msra.mxu0 %v3060_v63  ;;  %3326 = vmatprep.mubr.msk.f32.mxu0 %vm3860_vm7, %v3859_v0  ;;  %v2308_v63 = vld [vmem:[#allocation7 + $0x20] sm:$0xff] }
 0x322   : > { %3310 = vmatprep.subr.mxu0 %v3859_v0 }
 0x323   : > { %3311 = vmatpush3.msra.mxu0 %v3059_v2  ;;  %v2307_v2 = vld [vmem:[#allocation7 + $0x18] sm:$0xff] }
 0x324   : > { %3312 = vmatprep.subr.mxu0 %v3859_v0 }
 0x325   : > { %3313 = vmatpush3.msra.mxu0 %v3058_v3  ;;  %v2389_v3 = vld [vmem:[#allocation7 + $0x48] sm:$0xff] }
 0x326   : > { %3314 = vmatprep.subr.mxu0 %v3859_v0 }
 0x327   : > { %3315 = vmatpush3.msra.mxu0 %v3057_v4  ;;  %v2306_v4 = vld [vmem:[#allocation7 + $0x10] sm:$0xff] }
 0x328   : > { %3316 = vmatprep.subr.mxu0 %v3859_v0 }
 0x329   : > { %3317 = vmatpush3.msra.mxu0 %v3056_v5  ;;  %v2388_v5 = vld [vmem:[#allocation7 + $0x40] sm:$0xff] }
 0x32a   : > { %3318 = vmatprep.subr.mxu0 %v3859_v0 }
 0x32b   : > { %3319 = vmatpush3.msra.mxu0 %v3055_v6  ;;  %v2305_v6 = vld [vmem:[#allocation7 + $0x8] sm:$0xff] }
 0x32c   : > { %3320 = vmatprep.subr.mxu0 %v3859_v0 }
 0x32d   : > { %3321 = vmatpush3.msra.mxu0 %v3054_v7  ;;  %v2304_v7 = vld [vmem:[#allocation7] sm:$0xff] }
 0x32e   : > { %3322 = vmatprep.subr.mxu0 %v3859_v0 }
 0x32f   : > { %3323 = vmatpush3.msra.mxu0 %v3053_v8  ;;  %v2387_v8 = vld [vmem:[#allocation7 + $0x38] sm:$0xff] }
 0x330   : > { %3324 = vmatprep.subr.mxu0 %v3859_v0 }
 0x331   : > { %3325 = vmatpush3.msra.mxu0 %v3052_v10 }
 0x332   : > { %3327 = vmatmul.mubr.msk.f32.vlgmr.msra.gmra.mxu0 %vm1570_vm8, %v1899_v12  ;;  %3366 = vmatprep.subr.mxu0 %v3859_v0 }
 0x333   : > { %3390 = vmatprep.mubr.msk.f32.mxu0 %vm3860_vm7, %v3859_v0  ;;  %3367 = vmatpush3.msra.mxu0 %v3078_v13  ;;  %v2472_v13 = vld [vmem:[#allocation7 + $0x88] sm:$0xff] }
 0x334   : > { %3368 = vmatprep.subr.mxu0 %v3859_v0 }
 0x335   : > { %3369 = vmatpush3.msra.mxu0 %v3077_v14 }
 0x336   : > { %3370 = vmatprep.subr.mxu0 %v3859_v0 }
 0x337   : > { %3371 = vmatpush3.msra.mxu0 %v3076_v15 }
 0x338   : > { %3372 = vmatprep.subr.mxu0 %v3859_v0 }
 0x339   : > { %3373 = vmatpush3.msra.mxu0 %v3075_v16 }
 0x33a   : > { %3374 = vmatprep.subr.mxu0 %v3859_v0 }
 0x33b   : > { %3375 = vmatpush3.msra.mxu0 %v3074_v17  ;;  %v2471_v17 = vld [vmem:[#allocation7 + $0x80] sm:$0xff] }
 0x33c   : > { %3376 = vmatprep.subr.mxu0 %v3859_v0 }
 0x33d   : > { %3377 = vmatpush3.msra.mxu0 %v3073_v18  ;;  %v2553_v18 = vld [vmem:[#allocation7 + $0xb8] sm:$0xff] }
 0x33e   : > { %3378 = vmatprep.subr.mxu0 %v3859_v0 }
 0x33f   : > { %3379 = vmatpush3.msra.mxu0 %v3072_v19  ;;  %v2470_v19 = vld [vmem:[#allocation7 + $0x78] sm:$0xff] }
 0x340   : > { %3380 = vmatprep.subr.mxu0 %v3859_v0 }
 0x341   : > { %3381 = vmatpush3.msra.mxu0 %v3071_v20  ;;  %v2552_v20 = vld [vmem:[#allocation7 + $0xb0] sm:$0xff] }
 0x342   : > { %3382 = vmatprep.subr.mxu0 %v3859_v0 }
 0x343   : > { %3383 = vmatpush3.msra.mxu0 %v3070_v49  ;;  %v2723_v49 = vld [vmem:[%s4860_s13 + $0x18] sm:$0xff] }
 0x344   : > { %3384 = vmatprep.subr.mxu0 %v3859_v0 }
 0x345   : > { %3385 = vmatpush3.msra.mxu0 %v3069_v51 }
 0x346   : > { %3386 = vmatprep.subr.mxu0 %v3859_v0 }
 0x347   : > { %3387 = vmatpush3.msra.mxu0 %v3068_v53  ;;  %v2303_v53 = vld [vmem:[#allocation8] sm:$0x1] }
 0x348   : > { %3388 = vmatprep.subr.mxu0 %v3859_v0 }
 0x349   : > { %3389 = vmatpush3.msra.mxu0 %v3067_v55 }
 0x34a   : > { %3408 = vmatprep.subr.mxu0 %v3859_v0 }
 0x3c7   : > { %v1711_v21 = vpop.f32.mrf.mxu1 }
 0x3c9   : > { %v3265_v22 = vpop.f32.mrf.mxu1 }
 0x3ca   : > { %v2551_v22 = vld [vmem:[#allocation7 + $0xa8] sm:$0xff] }
 0x3ce   : > { %v1639_v23 = vpop.f32.mrf.mxu0 }
 0x3cf   : > { %v1712_v29 = vadd.f32 %v1711_v21, %v1639_v23  ;;  %v2469_v21 = vld [vmem:[#allocation7 + $0x70] sm:$0xff]  ;;  %v2468_v23 = vld [vmem:[#allocation7 + $0x68] sm:$0xff] }
 0x3d0   : > { %v3244_v24 = vpop.f32.mrf.mxu0 }
 0x3d1   : > { %v2550_v24 = vld [vmem:[#allocation7 + $0xa0] sm:$0xff] }
 0x3d9   : > { %v1882_v25 = vpop.f32.mrf.mxu1 }
 0x3db   : > { %v3307_v26 = vpop.f32.mrf.mxu1 }
 0x3dc   : > { %v2549_v26 = vld [vmem:[#allocation7 + $0x98] sm:$0xff] }
 0x3e0   : > { %v1796_v27 = vpop.f32.mrf.mxu0 }
 0x3e1   : > { %v1800_v30 = vadd.f32 %v1796_v27, %v1712_v29 }
 0x3e2   : > { %v3286_v28 = vpop.f32.mrf.mxu0 }
 0x3e3   : > { %v1886_v31 = vadd.f32 %v1882_v25, %v1800_v30  ;;  %v2467_v25 = vld [vmem:[#allocation7 + $0x60] sm:$0xff]  ;;  %v2548_v28 = vld [vmem:[#allocation7 + $0x90] sm:$0xff] }
 0x3e4   : > { %v2643_v30 = vld [vmem:[%s4858_s11 + $0x70] sm:$0xff] }
 0x3f2   : > { %v1968_v32 = vpop.f32.mrf.mxu0 }
 0x3f3   : > { %v1972_v34 = vadd.f32 %v1968_v32, %v1886_v31  ;;  %v2642_v31 = vld [vmem:[%s4858_s11 + $0x68] sm:$0xff]  ;;  %v2641_v32 = vld [vmem:[%s4858_s11 + $0x60] sm:$0xff] }
 0x3f4   : > { %v3328_v35 = vpop.f32.mrf.mxu0 }
 0x3f5   : > { %v1980_v36 = vadd.f32 %v3062_v33, %v1972_v34  ;;  %v2640_v33 = vld [vmem:[%s4858_s11 + $0x58] sm:$0xff]  ;;  %v2639_v34 = vld [vmem:[%s4858_s11 + $0x50] sm:$0xff]  ;;  %v2638_v35 = vld [vmem:[%s4858_s11 + $0x48] sm:$0xff] }
 0x3f7   : > { %v1981_v37 = vmax.f32 %v1980_v36, 0.0  ;;  %v2637_v36 = vld [vmem:[%s4858_s11 + $0x40] sm:$0xff] }
 0x3f9   : > { %3330 = vmatpush3.msra.mxu1 %v1981_v37 }
 0x3fa   : > { %3332 = vmatmul.mubr.msk.f32.vlgmr.msra.gmra.mxu1 %vm1983_vm9, %v1982_v38  ;;  %3334 = vmatprep.subr.mxu1 %v3859_v0  ;;  %v2635_v38 = vld [vmem:[%s4858_s11 + $0x30] sm:$0xff] }
 0x3fb   : > { %3335 = vmatpush3.msra.mxu1 %v1981_v37  ;;  %3336 = vmatprep.mubr.msk.f32.mxu1 %vm3860_vm7, %v3859_v0  ;;  %v2636_v37 = vld [vmem:[%s4858_s11 + $0x38] sm:$0xff] }
 0x3fc   : > { %3339 = vmatprep.subr.mxu1 %v3859_v0 }
 0x3fe   : > { %3337 = vmatmul.mubr.msk.f32.vlgmr.msra.gmra.mxu1 %vm1983_vm9, %v3064_v39  ;;  %v2634_v39 = vld [vmem:[%s4858_s11 + $0x28] sm:$0xff] }
 0x3ff   : > { %3340 = vmatpush3.msra.mxu1 %v2144_v40  ;;  %3363 = vmatprep.mubr.msk.f32.mxu1 %vm3860_vm7, %v3859_v0  ;;  %v2633_v40 = vld [vmem:[%s4858_s11 + $0x20] sm:$0xff] }
 0x400   : > { %3341 = vmatprep.subr.mxu1 %v3859_v0 }
 0x401   : > { %3342 = vmatpush3.msra.mxu1 %v2143_v41  ;;  %v2632_v41 = vld [vmem:[%s4858_s11 + $0x18] sm:$0xff] }
 0x402   : > { %3343 = vmatprep.subr.mxu1 %v3859_v0 }
 0x403   : > { %3344 = vmatpush3.msra.mxu1 %v2142_v42  ;;  %v2631_v42 = vld [vmem:[%s4858_s11 + $0x10] sm:$0xff] }
 0x404   : > { %3345 = vmatprep.subr.mxu1 %v3859_v0 }
 0x405   : > { %3346 = vmatpush3.msra.mxu1 %v2141_v43  ;;  %v2630_v43 = vld [vmem:[%s4858_s11 + $0x8] sm:$0xff] }
 0x406   : > { %3347 = vmatprep.subr.mxu1 %v3859_v0 }
 0x407   : > { %3348 = vmatpush3.msra.mxu1 %v2140_v44  ;;  %v2629_v44 = vld [vmem:[%s4858_s11] sm:$0xff] }
 0x408   : > { %3349 = vmatprep.subr.mxu1 %v3859_v0 }
 0x409   : > { %3350 = vmatpush3.msra.mxu1 %v2139_v45  ;;  %v2727_v45 = vld [vmem:[%s4860_s13 + $0x38] sm:$0xf] }
 0x40a   : > { %3351 = vmatprep.subr.mxu1 %v3859_v0 }
 0x40b   : > { %3352 = vmatpush3.msra.mxu1 %v2138_v46  ;;  %v2726_v46 = vld [vmem:[%s4860_s13 + $0x30] sm:$0xff] }
 0x40c   : > { %3353 = vmatprep.subr.mxu1 %v3859_v0 }
 0x40d   : > { %3354 = vmatpush3.msra.mxu1 %v2137_v47  ;;  %v2725_v47 = vld [vmem:[%s4860_s13 + $0x28] sm:$0xff] }
 0x40e   : > { %3355 = vmatprep.subr.mxu1 %v3859_v0 }
 0x40f   : > { %3356 = vmatpush3.msra.mxu1 %v2136_v48  ;;  %v2724_v48 = vld [vmem:[%s4860_s13 + $0x20] sm:$0xff] }
 0x410   : > { %3357 = vmatprep.subr.mxu1 %v3859_v0 }
 0x411   : > { %3358 = vmatpush3.msra.mxu1 %v2135_v50 }
 0x412   : > { %3359 = vmatprep.subr.mxu1 %v3859_v0 }
 0x413   : > { %3360 = vmatpush3.msra.mxu1 %v2134_v52 }
 0x414   : > { %3361 = vmatprep.subr.mxu1 %v3859_v0 }
 0x415   : > { %3362 = vmatpush3.msra.mxu1 %v2133_v54 }
 0x416   : > { %3393 = vmatprep.subr.mxu1 %v3859_v0 }
 0x4ba   : > { %v2053_v56 = vpop.f32.mrf.mxu1 }
 0x4bc   : > { %v3333_v57 = vpop.f32.mrf.mxu1 }
 0x4be   : > { %v2128_v58 = vpop.f32.mrf.mxu1 }
 0x4bf   : > { %v2132_v59 = vmax.f32 %v2053_v56, %v2128_v58 }
 0x4c0   : > { %v3338_v62 = vpop.f32.mrf.mxu1 }
 0x4c1   : > { %3364 = vmatmul.mubr.msk.f32.vlgmr.msra.gmra.mxu1 %vm2145_vm10, %v2132_v59  ;;  %3391 = vmatmul.mubr.msk.f32.vlgmr.msra.gmra.mxu0 %vm2145_vm10, %v2132_v59 }
 0x4c2   : > { %3394 = vmatpush3.msra.mxu1 %v2309_v60  ;;  %3409 = vmatpush3.msra.mxu0 %v2391_v61 }
 0x4c3   : > { %3395 = vmatprep.subr.mxu1 %v3859_v0  ;;  %3410 = vmatprep.subr.mxu0 %v3859_v0 }
 0x4c4   : > { %3396 = vmatpush3.msra.mxu1 %v2308_v63  ;;  %3411 = vmatpush3.msra.mxu0 %v2390_v1  ;;  %v2722_v1 = vld [vmem:[%s4860_s13 + $0x10] sm:$0xff] }
 0x4c5   : > { %3397 = vmatprep.subr.mxu1 %v3859_v0  ;;  %3412 = vmatprep.subr.mxu0 %v3859_v0 }
 0x4c6   : > { %3398 = vmatpush3.msra.mxu1 %v2307_v2  ;;  %3413 = vmatpush3.msra.mxu0 %v2389_v3  ;;  %v2721_v2 = vld [vmem:[%s4860_s13 + $0x8] sm:$0xff]  ;;  %v2720_v3 = vld [vmem:[%s4860_s13] sm:$0xff] }
 0x4c7   : > { %3399 = vmatprep.subr.mxu1 %v3859_v0  ;;  %3414 = vmatprep.subr.mxu0 %v3859_v0 }
 0x4c8   : > { %3400 = vmatpush3.msra.mxu1 %v2306_v4  ;;  %3415 = vmatpush3.msra.mxu0 %v2388_v5  ;;  %v2644_v4 = vld [vmem:[#allocation10] sm:$0x1] }
 0x4c9   : > { %3401 = vmatprep.subr.mxu1 %v3859_v0  ;;  %3416 = vmatprep.subr.mxu0 %v3859_v0 }
 0x4ca   : > { %3402 = vmatpush3.msra.mxu1 %v2305_v6  ;;  %3405 = vmatprep.mubr.msk.f32.mxu1 %vm3860_vm7, %v3859_v0 }
 0x4cb   : > { %3403 = vmatprep.subr.mxu1 %v3859_v0  ;;  %3420 = vmatprep.mubr.msk.f32.mxu0 %vm3860_vm7, %v3859_v0 }
 0x4cc   : > { %3404 = vmatpush3.msra.mxu1 %v2304_v7  ;;  %3417 = vmatpush3.msra.mxu0 %v2387_v8 }
 0x4cd   : > { %3418 = vmatprep.subr.mxu0 %v3859_v0  ;;  %3423 = vmatprep.subr.mxu1 %v3859_v0 }
 0x4ce   : > { %3419 = vmatpush3.msra.mxu0 %v2386_v9  ;;  %v2728_v9 = vld [vmem:[#allocation11] sm:$0x1] }
 0x4cf   : > { %3438 = vmatprep.subr.mxu0 %v3859_v0 }
 0x581   : > { %v2215_v10 = vpop.f32.mrf.mxu1  ;;  %v2298_v11 = vpop.f32.mrf.mxu0 }
 0x582   : > { %v2302_v12 = vmax.f32 %v2215_v10, %v2298_v11 }
 0x583   : > { %v3365_v14 = vpop.f32.mrf.mxu1  ;;  %v3392_v15 = vpop.f32.mrf.mxu0 }
 0x584   : > { %v2392_v16 = vrot.slane %v2302_v12, 1  ;;  %3406 = vmatmul.mubr.msk.f32.vlgmr.msra.gmra.mxu1 %vm2310_vm11, %v2302_v12  ;;  %v2473_v27 = vrot.slane %v2302_v12, 2  ;;  %v2554_v29 = vrot.slane %v2302_v12, 3 }
 0x585   : > { %3424 = vmatpush3.msra.mxu1 %v2472_v13  ;;  %3435 = vmatprep.mubr.msk.f32.mxu1 %vm3860_vm7, %v3859_v0 }
 0x586   : > { %3425 = vmatprep.subr.mxu1 %v3859_v0  ;;  %3421 = vmatmul.mubr.msk.f32.vlgmr.msra.gmra.mxu0 %vm2310_vm11, %v2392_v16 }
 0x587   : > { %3426 = vmatpush3.msra.mxu1 %v2471_v17  ;;  %3439 = vmatpush3.msra.mxu0 %v2553_v18 }
 0x588   : > { %3427 = vmatprep.subr.mxu1 %v3859_v0  ;;  %3440 = vmatprep.subr.mxu0 %v3859_v0 }
 0x589   : > { %3428 = vmatpush3.msra.mxu1 %v2470_v19  ;;  %3441 = vmatpush3.msra.mxu0 %v2552_v20 }
 0x58a   : > { %3429 = vmatprep.subr.mxu1 %v3859_v0  ;;  %3442 = vmatprep.subr.mxu0 %v3859_v0 }
 0x58b   : > { %3430 = vmatpush3.msra.mxu1 %v2469_v21  ;;  %3443 = vmatpush3.msra.mxu0 %v2551_v22 }
 0x58c   : > { %3431 = vmatprep.subr.mxu1 %v3859_v0  ;;  %3444 = vmatprep.subr.mxu0 %v3859_v0 }
 0x58d   : > { %3432 = vmatpush3.msra.mxu1 %v2468_v23  ;;  %3445 = vmatpush3.msra.mxu0 %v2550_v24 }
 0x58e   : > { %3433 = vmatprep.subr.mxu1 %v3859_v0  ;;  %3446 = vmatprep.subr.mxu0 %v3859_v0 }
 0x58f   : > { %3434 = vmatpush3.msra.mxu1 %v2467_v25  ;;  %3447 = vmatpush3.msra.mxu0 %v2549_v26 }
 0x590   : > { %3436 = vmatmul.mubr.msk.f32.vlgmr.msra.gmra.mxu1 %vm2310_vm11, %v2473_v27  ;;  %3448 = vmatprep.subr.mxu0 %v3859_v0 }
 0x591   : > { %3449 = vmatpush3.msra.mxu0 %v2548_v28  ;;  %3450 = vmatprep.mubr.msk.f32.mxu0 %vm3860_vm7, %v3859_v0 }
 0x592   : > { %3451 = vmatmul.mubr.msk.f32.vlgmr.msra.gmra.mxu0 %vm2310_vm11, %v2554_v29  ;;  %3453 = vmatprep.subr.mxu1 %v3859_v0 }
 0x593   : > { %3454 = vmatpush3.msra.mxu1 %v2643_v30  ;;  %3483 = vmatprep.mubr.msk.f32.mxu1 %vm3860_vm7, %v3859_v0 }
 0x594   : > { %3455 = vmatprep.subr.mxu1 %v3859_v0  ;;  %3486 = vmatprep.subr.mxu0 %v3859_v0 }
 0x595   : > { %3456 = vmatpush3.msra.mxu1 %v2642_v31  ;;  %3502 = vmatprep.mubr.msk.f32.mxu0 %vm3860_vm7, %v3859_v0 }
 0x596   : > { %3457 = vmatprep.subr.mxu1 %v3859_v0  ;;  %3487 = vmatpush3.msk.msra.mxu0 %vm612_vm0, %v2727_v45 }
 0x597   : > { %3458 = vmatpush3.msra.mxu1 %v2641_v32  ;;  %3488 = vmatprep.subr.mxu0 %v3859_v0 }
 0x598   : > { %3459 = vmatprep.subr.mxu1 %v3859_v0  ;;  %3489 = vmatpush3.msra.mxu0 %v2726_v46 }
 0x599   : > { %3460 = vmatpush3.msra.mxu1 %v2640_v33  ;;  %3490 = vmatprep.subr.mxu0 %v3859_v0 }
 0x59a   : > { %3461 = vmatprep.subr.mxu1 %v3859_v0  ;;  %3491 = vmatpush3.msra.mxu0 %v2725_v47 }
 0x59b   : > { %3462 = vmatpush3.msra.mxu1 %v2639_v34  ;;  %3492 = vmatprep.subr.mxu0 %v3859_v0 }
 0x59c   : > { %3463 = vmatprep.subr.mxu1 %v3859_v0  ;;  %3493 = vmatpush3.msra.mxu0 %v2724_v48 }
 0x59d   : > { %3464 = vmatpush3.msra.mxu1 %v2638_v35  ;;  %3494 = vmatprep.subr.mxu0 %v3859_v0 }
 0x59e   : > { %3465 = vmatprep.subr.mxu1 %v3859_v0  ;;  %3495 = vmatpush3.msra.mxu0 %v2723_v49 }
 0x59f   : > { %3466 = vmatpush3.msra.mxu1 %v2637_v36  ;;  %3496 = vmatprep.subr.mxu0 %v3859_v0 }
 0x5a0   : > { %3467 = vmatprep.subr.mxu1 %v3859_v0  ;;  %3497 = vmatpush3.msra.mxu0 %v2722_v1 }
 0x5a1   : > { %3468 = vmatpush3.msra.mxu1 %v2636_v37  ;;  %3498 = vmatprep.subr.mxu0 %v3859_v0 }
 0x5a2   : > { %3469 = vmatprep.subr.mxu1 %v3859_v0  ;;  %3499 = vmatpush3.msra.mxu0 %v2721_v2 }
 0x5a3   : > { %3470 = vmatpush3.msra.mxu1 %v2635_v38  ;;  %3500 = vmatprep.subr.mxu0 %v3859_v0 }
 0x5a4   : > { %3471 = vmatprep.subr.mxu1 %v3859_v0  ;;  %3501 = vmatpush3.msra.mxu0 %v2720_v3 }
 0x5a5   : > { %3472 = vmatpush3.msra.mxu1 %v2634_v39 }
 0x5a6   : > { %3473 = vmatprep.subr.mxu1 %v3859_v0 }
 0x5a7   : > { %3474 = vmatpush3.msra.mxu1 %v2633_v40 }
 0x5a8   : > { %3475 = vmatprep.subr.mxu1 %v3859_v0 }
 0x5a9   : > { %3476 = vmatpush3.msra.mxu1 %v2632_v41 }
 0x5aa   : > { %3477 = vmatprep.subr.mxu1 %v3859_v0 }
 0x5ab   : > { %3478 = vmatpush3.msra.mxu1 %v2631_v42 }
 0x5ac   : > { %3479 = vmatprep.subr.mxu1 %v3859_v0 }
 0x5ad   : > { %3480 = vmatpush3.msra.mxu1 %v2630_v43 }
 0x5ae   : > { %3481 = vmatprep.subr.mxu1 %v3859_v0 }
 0x5af   : > { %3482 = vmatpush3.msra.mxu1 %v2629_v44 }
 0x644   : > { %v2380_v50 = vpop.f32.mrf.mxu1 }
 0x645   : > { %v2384_v55 = vadd.f32 %v2380_v50, %v2303_v53 }
 0x646   : > { %v3407_v51 = vpop.f32.mrf.mxu1  ;;  %v2461_v52 = vpop.f32.mrf.mxu0 }
 0x647   : > { %v2465_v56 = vadd.f32 %v2461_v52, %v2384_v55 }
 0x648   : > { %v3422_v54 = vpop.f32.mrf.mxu0 }
 0x650   : > { %v2542_v57 = vpop.f32.mrf.mxu1 }
 0x651   : > { %v2546_v58 = vadd.f32 %v2542_v57, %v2465_v56 }
 0x652   : > { %v3437_v59 = vpop.f32.mrf.mxu1  ;;  %v2623_v60 = vpop.f32.mrf.mxu0 }
 0x653   : > { %v2627_v61 = vadd.f32 %v2623_v60, %v2546_v58 }
 0x654   : > { %v3452_v62 = vpop.f32.mrf.mxu0 }
 0x655   : > { %v2628_v63 = vmax.f32 %v2627_v61, 0.0 }
 0x657   : > { %3484 = vmatmul.mubr.msk.f32.vlgmr.msra.gmra.mxu1 %vm2645_vm12, %v2628_v63 }
 0x717   : > { %v2715_v5 = vpop.f32.mrf.mxu1 }
 0x718   : > { %v2716_v6 = vadd.f32 %v2715_v5, %v2644_v4 }
 0x719   : > { %v3485_v7 = vpop.f32.mrf.mxu1 }
 0x71a   : > { %v2719_v8 = vmax.f32 %v2716_v6, 0.0 }
 0x71c   : > { %3503 = vmatmul.mubr.msk.f32.vlgmr.msra.gmra.mxu0 %vm2729_vm13, %v2719_v8 }
 0x7dc   : > { %v2802_v10 = vpop.f32.mrf.mxu0 }
 0x7dd   : > { %v2803_v0 = vadd.f32 %v2802_v10, %v2728_v9 }
 0x7de   : > { %v3504_v11 = vpop.f32.mrf.mxu0 }
 0x7df   : > { %2807 = vst.msk [vmem:[%s566_s30] sm:$0x1] %vm2806_vm14, %v2803_v0 }
 0x7e0   : > { %3786 = shalt.err (!%p3783_p0)
}
 0x7e1   : > { %s3787_s21 = scalar_lea.hbm %s4812_s24, 16  ;;  %s3791_s30 = scalar_lea.hbm %s4898_s16, 32 }
 0x7e2   : > { %p3788_p1 = scmp.ne.s32.totalorder %s4812_s24, %s3787_s21  ;;  %p3792_p2 = scmp.lt.s32.totalorder %s4812_s24, %s4898_s16 }
 0x7e3   : > { %p3793_p6 = scmp.lt.s32.totalorder %s3791_s30, %s3787_s21 }
 0x7e4   : > { %p3789_p9 = pnand %p3788_p1, %p4899_p3 }
 0x7e5   : > { %p3794_p5 = por %p3793_p6, %p3792_p2 }
 0x7e6   : > { %p3790_p12 = pneg %p3789_p9 }
 0x7e8   : > { %p3795_p10 = pnand %p3794_p5, %p3790_p12 }
 0x7ea   : > { %3798 = shalt.err (!%p3795_p10)
}
 0x7eb   : > { %3537 = dma.vmem_to_hbm [thread:$0]  (%p4899_p3), %s2822_s25, 16, %s4812_s24, %s2809_s20  }
 0x7ec PF: > { %s4900_s18 = sld [smem:[#allocation21_spill]] }
 0x7ed   : > { %s4901_s22 = sld [smem:[#allocation19_spill]] }
 0x7ee   : > { %s4902_s23 = sld [smem:[#allocation25_spill]] }
 0x7f2   : > { %p3574_p4 = scmp.ge.s32.totalorder %s4900_s18, 2 }
 0x7f3   : > { %s2833_s26 = sand.u32 1, %s4901_s22  }
 0x7f4   : > { %p4903_p7 = scmp.ne.s32.totalorder %s4902_s23, 0  ;;  %s2834_s15 = scalar_lea.sflag [#allocation4], %s2833_s26 }
 0x7f6   : > { %p3559_p8 = pnand %p3574_p4, %p4903_p7 }
 0x7f8   : > { %p3560_p11 = pneg %p3559_p8 }
 0x7fa   : > { %3832 = dma.done.wait (%p3560_p11), %s2834_s15, 16  }
 0x7fb   : > { %3834 = vsyncadd (%p3560_p11), %s2834_s15, 4294967280  ;;  %s4904_s21 = sld [smem:[#allocation22_spill]]  ;;  %s4907_s18 = smov %s3841_s19 }
 0x7fc   : > { %s4905_s17 = sld [smem:[#allocation20_spill]] }
 0x7fd   : > { %s4906_s20 = sld [smem:[#allocation23_spill]] }
 0x801   : > { %p29_p13 = scmp.ge.s32.totalorder %s4904_s21, 4  }
 0x802   : > { %s4908_s19 = smov %s4905_s17 }
 0x803   :  { %31 = sbr.rel (!%p29_p13) target bundleno = 9 (0x9), region = 155 }
 0x808   :  { %2838 = vsyncpa [#allocation3], 1 }
 0x809   :  { %2840 = vsyncpa [#allocation3 + $0x1], 1 }
 0x80a   :  { %2841 = vsyncpa [#allocation6], 1 }
 0x80b   :  { %2842 = vsyncpa [#allocation9], 1 }
 0x80c   :  { %2843 = vsyncpa [#allocation12], 1 }
 0x80d   :  { %2844 = vsyncpa [#allocation4], 1 }
 0x80e   :  { %2846 = vsyncpa [#allocation4 + $0x1], 1 }

</bundles_post_ra>
